<compile_context>
chip_gen: v7x
topology: tpu7x:2x2x1
jax: 0.10.0
libtpu: 0.0.40
codegen_flags: <defaults>
</compile_context>

<pallas_src>
import jax
import jax.numpy as jnp
from jax.experimental import pallas as pl
from jax.experimental.pallas import tpu as pltpu


def st_gcn_kernel(x_ref, wcat_ref, w2_ref, t1_ref, bsum_ref, out_ref):
    """One batch block.

    x_ref:    (Bn, Cin*TV)            activations, row n = sample, cols = (ci, v)
    wcat_ref: (Cin*TV, 2*Cout*TV)     [gcn(+A,+BN1 scale) | residual(+BN_r scale)]
    w2_ref:   (Cout*TV, Cout*TV)      tcn 1x1 conv with BN2 scale, block-diag in TV
    t1_ref:   (1, Cout*TV) f32        BN1 shift + gcn bias routed through A
    bsum_ref: (1, Cout*TV) f32        folded tcn + residual biases/shifts
    out_ref:  (Bn, Cout*TV) f32
    """
    ctv = w2_ref.shape[0]

    # Fused (gcn ⊗ A) + residual 1x1 conv: one lane-dense MXU op, batch on sublanes.
    hc = jnp.dot(x_ref[...], wcat_ref[...], preferred_element_type=jnp.float32)
    y = hc[:, :ctv]                                  # s1 * graph-aggregated gcn output
    r = hc[:, ctv:]                                  # sr * residual conv output

    z = jnp.maximum(y + t1_ref[...], 0.0)            # BN1 shift + ReLU (f32 tail)
    u = jnp.dot(z.astype(w2_ref.dtype), w2_ref[...],
                preferred_element_type=jnp.float32)  # tcn conv + BN2 scale

    out_ref[...] = jnp.maximum(u + r + bsum_ref[...], 0.0)   # biases + add + ReLU


def _fold_params(params, A, compute_dtype):
    """Fold BatchNorms, biases and the adjacency A into matmul weights (in f32)."""
    K, tv, _ = A.shape
    c_out, c_in = params["wr"].shape
    eye = jnp.eye(tv, dtype=jnp.float32)

    s1, t1 = params["s1"], params["t1"]
    s2, t2 = params["s2"], params["t2"]
    sr, tr = params["sr"], params["tr"]

    # gcn conv with BN1 scale folded, then A folded in:
    #   Wg[(ci,v),(c,w)] = sum_k s1[c] * W1[k*Cout+c, ci] * A[k, v, w]
    w1s = (params["w1"] * jnp.tile(s1, K)[:, None]).reshape(K, c_out, c_in)
    wg = jnp.einsum("kci,kvw->ivcw", w1s, A).reshape(c_in * tv, c_out * tv)

    # learned residual conv with BN_r scale folded (identity over the node dim):
    #   Wr[(ci,v),(c,w)] = sr[c] * Wr[c, ci] * delta(v, w)
    wrs = params["wr"] * sr[:, None]
    wr = jnp.einsum("ci,vw->ivcw", wrs, eye).reshape(c_in * tv, c_out * tv)

    wcat = jnp.concatenate([wg, wr], axis=1)                  # (Cin*TV, 2*Cout*TV)

    # tcn conv with BN2 scale folded, expanded to act on the flat (c, w) axis:
    #   W2[(c',w'),(c,w)] = s2[c] * W2[c, c'] * delta(w', w)
    w2p = params["w2"] * s2[:, None]
    w2 = jnp.einsum("cd,vw->dvcw", w2p, eye).reshape(c_out * tv, c_out * tv)

    # BN1 shift + gcn bias routed through A:  t1[c] + sum_{k,v} s1[c]*b1[k*Cout+c]*A[k,v,w]
    b1s = (params["b1"] * jnp.tile(s1, K)).reshape(K, c_out)
    colsum = A.sum(axis=1)                                    # (K, TV)
    t1full = (t1[:, None] + jnp.einsum("kc,kw->cw", b1s, colsum)).reshape(1, c_out * tv)

    # remaining biases/shifts (tcn bias + BN2 shift + residual bias + BN_r shift)
    b2p = s2 * params["b2"] + t2
    brp = sr * params["br"] + tr
    bsum = jnp.repeat(b2p + brp, tv).reshape(1, c_out * tv)

    return (wcat.astype(compute_dtype), w2.astype(compute_dtype),
            t1full.astype(jnp.float32), bsum.astype(jnp.float32))


def _pick_block_n(n, cap=512):
    """Largest batch block that divides n, is sublane-friendly (multiple of 8 or
    equal to n), stays under `cap` samples (per-step working set ~10 KB/sample
    incl. intermediates -> ~5 MiB at cap=512, safe vs v7x's 64 MiB VMEM), and
    leaves >= 2 grid steps whenever n >= 2 so both v7x TensorCores get work."""
    target = min(cap, n // 2) if n >= 2 else n
    for b in range(target, 0, -1):
        if n % b == 0 and (b % 8 == 0 or b == n):
            return b
    return n   # fall back to a single grid step


def st_gcn_forward(x_nchw, A, params, block_n=None, compute_dtype=jnp.float32):
    """x_nchw: (N, Cin, 1, TV), A: (K, TV, TV). Returns ((N, Cout, 1, TV) f32, A)."""
    N, c_in, one, tv = x_nchw.shape
    assert one == 1
    c_out = params["wr"].shape[0]
    ctv = c_out * tv

    A32 = A.astype(jnp.float32)
    wcat, w2, t1full, bsum = _fold_params(params, A32, compute_dtype)

    # NCHW -> (N, Cin*TV): pure row-major reshape, no HBM data movement.
    x = x_nchw.reshape(N, c_in * tv).astype(compute_dtype)

    if block_n is None:
        block_n = _pick_block_n(N)
    assert N % block_n == 0, "general N needs a padded/masked tail block"
    grid = (N // block_n,)

    def full(arr):
        return pl.BlockSpec(arr.shape, lambda i: (0,) * arr.ndim)

    itemsize = jnp.dtype(compute_dtype).itemsize
    cost = pl.CostEstimate(
        flops=2 * N * (c_in * tv * 2 * ctv + ctv * ctv),
        transcendentals=0,
        bytes_accessed=(x.size * itemsize + N * ctv * 4
                        + (wcat.size + w2.size) * itemsize
                        + (t1full.size + bsum.size) * 4),
    )

    out = pl.pallas_call(
        st_gcn_kernel,
        out_shape=jax.ShapeDtypeStruct((N, ctv), jnp.float32),
        grid_spec=pltpu.PrefetchScalarGridSpec(
            num_scalar_prefetch=0,
            grid=grid,
            in_specs=[
                pl.BlockSpec((block_n, c_in * tv), lambda i: (i, 0)),   # x batch block
                full(wcat),      # fused gcn(+A) | residual weights (VMEM-resident)
                full(w2),        # folded tcn conv
                full(t1full),    # BN1 shift + b1@A
                full(bsum),      # tcn + residual biases/shifts
            ],
            out_specs=pl.BlockSpec((block_n, ctv), lambda i: (i, 0)),
        ),
        compiler_params=pltpu.CompilerParams(
            dimension_semantics=("parallel",),
            vmem_limit_bytes=32 * 1024 * 1024,
        ),
        cost_estimate=cost,
    )(x, wcat, w2, t1full, bsum)

    # (N, Cout*TV) -> (N, Cout, 1, TV): pure reshape, no data movement.
    return out.reshape(N, c_out, 1, tv), A


def make_params(key, c_in, c_out, K):
    """Deterministic synthetic parameters (conv weights + folded BatchNorm stats)."""
    ks = jax.random.split(key, 9)
    eps = 1e-5

    def bn_fold(kg, kb, km, kv, c):
        gamma = 1.0 + 0.1 * jax.random.normal(kg, (c,), jnp.float32)
        beta = 0.1 * jax.random.normal(kb, (c,), jnp.float32)
        mean = 0.1 * jax.random.normal(km, (c,), jnp.float32)
        var = jnp.abs(jax.random.normal(kv, (c,), jnp.float32)) + 0.5
        scale = gamma / jnp.sqrt(var + eps)
        shift = beta - mean * scale
        return scale, shift

    p = {}
    p["w1"] = 0.1 * jax.random.normal(ks[0], (K * c_out, c_in), jnp.float32)
    p["b1"] = 0.05 * jax.random.normal(ks[1], (K * c_out,), jnp.float32)
    p["w2"] = 0.1 * jax.random.normal(ks[2], (c_out, c_out), jnp.float32)
    p["b2"] = 0.05 * jax.random.normal(ks[3], (c_out,), jnp.float32)
    p["wr"] = 0.1 * jax.random.normal(ks[4], (c_out, c_in), jnp.float32)
    p["br"] = 0.05 * jax.random.normal(ks[5], (c_out,), jnp.float32)
    p["s1"], p["t1"] = bn_fold(*jax.random.split(ks[6], 4), c_out)
    p["s2"], p["t2"] = bn_fold(*jax.random.split(ks[7], 4), c_out)
    p["sr"], p["tr"] = bn_fold(*jax.random.split(ks[8], 4), c_out)
    return p


def st_gcn_reference(x_nchw, A, params):
    """Pure-JAX reference mirroring the PyTorch forward (eval mode), in NCHW."""
    x = x_nchw[:, :, 0, :]                                    # (N, Cin, TV)
    K = A.shape[0]
    c_out = params["w2"].shape[0]
    h = jnp.einsum("oc,ncv->nov", params["w1"], x) + params["b1"][:, None]
    h = h.reshape(x.shape[0], K, c_out, x.shape[2])           # (N, K, Cout, TV)
    y = jnp.einsum("nkcv,kvw->ncw", h, A)
    z = jnp.maximum(y * params["s1"][:, None] + params["t1"][:, None], 0.0)
    u = jnp.einsum("oc,ncw->now", params["w2"], z) + params["b2"][:, None]
    u = u * params["s2"][:, None] + params["t2"][:, None]
    r = jnp.einsum("oc,ncv->nov", params["wr"], x) + params["br"][:, None]
    r = r * params["sr"][:, None] + params["tr"][:, None]
    out = jnp.maximum(u + r, 0.0)
    return out[:, :, None, :], A


if __name__ == "__main__":
    # Small shapes implied by the module: N batch, Cin channels, spatial = T*V.
    # N=32 gives block_n=16 -> grid=(2,), exercising the multi-step "parallel" grid.
    N, C_IN, C_OUT, K, T, V = 32, 4, 32, 3, 4, 4
    TV = T * V

    key = jax.random.PRNGKey(0)
    kx, ka, kp = jax.random.split(key, 3)
    x = jax.random.normal(kx, (N, C_IN, 1, TV), jnp.float32)
    A = jax.nn.softmax(jax.random.normal(ka, (K, TV, TV), jnp.float32), axis=-1)
    params = make_params(kp, C_IN, C_OUT, K)

    ref, _ = st_gcn_reference(x, A, params)

    # f32 compute path.
    out32, A_out = st_gcn_forward(x, A, params, compute_dtype=jnp.float32)
    out32 = jax.block_until_ready(out32)
    assert out32.shape == (N, C_OUT, 1, TV)
    assert jnp.allclose(out32, ref, atol=5e-3, rtol=5e-3)
    assert jnp.allclose(A_out, A)

    # bf16 compute path (halves HBM bytes; v5e's MXU is bf16-native). Accumulation
    # and the bias/ReLU tail stay f32, so only input/weight rounding differs.
    out16, _ = st_gcn_forward(x, A, params, compute_dtype=jnp.bfloat16)
    out16 = jax.block_until_ready(out16)
    assert out16.shape == (N, C_OUT, 1, TV)
    assert jnp.allclose(out16, ref, atol=3e-2, rtol=3e-2)

    print("KERNEL_OK")
</pallas_src>

<mosaic_0001>
module attributes {stable_mosaic.version = 11 : i64} {
  func.func @st_gcn_kernel(%arg0: i32, %arg1: memref<16x64xf32, #tpu.memory_space<vmem>>, %arg2: memref<64x1024xf32, #tpu.memory_space<vmem>>, %arg3: memref<512x512xf32, #tpu.memory_space<vmem>>, %arg4: memref<1x512xf32, #tpu.memory_space<vmem>>, %arg5: memref<1x512xf32, #tpu.memory_space<vmem>>, %arg6: memref<16x512xf32, #tpu.memory_space<vmem>>) attributes {dimension_semantics = [#tpu.dimension_semantics<parallel>], iteration_bounds = array<i64: 2>, scalar_prefetch = 0 : i64, scratch_operands = 0 : i64, tpu.core_type = #tpu.core_type<tc>, window_params = [{transform_indices = @transform_0, window_bounds = array<i64: 16, 64>}, {pipeline_mode = #tpu.pipeline_mode<synchronous>, transform_indices = @transform_1, window_bounds = array<i64: 64, 1024>}, {pipeline_mode = #tpu.pipeline_mode<synchronous>, transform_indices = @transform_2, window_bounds = array<i64: 512, 512>}, {pipeline_mode = #tpu.pipeline_mode<synchronous>, transform_indices = @transform_3, window_bounds = array<i64: 1, 512>}, {pipeline_mode = #tpu.pipeline_mode<synchronous>, transform_indices = @transform_4, window_bounds = array<i64: 1, 512>}, {transform_indices = @transform_5, window_bounds = array<i64: 16, 512>}]} {
    %c0 = arith.constant 0 : index
    %c0_0 = arith.constant 0 : index
    %0 = vector.load %arg1[%c0, %c0_0] : memref<16x64xf32, #tpu.memory_space<vmem>>, vector<16x64xf32>
    %c0_1 = arith.constant 0 : index
    %c0_2 = arith.constant 0 : index
    %1 = vector.load %arg2[%c0_1, %c0_2] : memref<64x1024xf32, #tpu.memory_space<vmem>>, vector<64x1024xf32>
    %cst = arith.constant dense<0.000000e+00> : vector<16x1024xf32>
    %2 = tpu.matmul %0, %1, %cst {dimension_numbers = #tpu.dot_dimension_numbers<[1], [0], [0], [1], [0, 0, 1, 1], [], []>} : vector<16x64xf32>, vector<64x1024xf32>, vector<16x1024xf32> -> vector<16x1024xf32>
    %3 = vector.extract_strided_slice %2 {offsets = [0, 0], sizes = [16, 512], strides = [1, 1]} : vector<16x1024xf32> to vector<16x512xf32>
    %4 = vector.extract_strided_slice %2 {offsets = [0, 512], sizes = [16, 512], strides = [1, 1]} : vector<16x1024xf32> to vector<16x512xf32>
    %c0_3 = arith.constant 0 : index
    %c0_4 = arith.constant 0 : index
    %5 = vector.load %arg4[%c0_3, %c0_4] : memref<1x512xf32, #tpu.memory_space<vmem>>, vector<1x512xf32>
    %6 = vector.broadcast %5 : vector<1x512xf32> to vector<16x512xf32>
    %7 = arith.addf %3, %6 : vector<16x512xf32>
    %cst_5 = arith.constant 0.000000e+00 : f32
    %8 = vector.broadcast %cst_5 : f32 to vector<16x512xf32>
    %9 = arith.maximumf %7, %8 : vector<16x512xf32>
    %c0_6 = arith.constant 0 : index
    %c0_7 = arith.constant 0 : index
    %10 = vector.load %arg3[%c0_6, %c0_7] : memref<512x512xf32, #tpu.memory_space<vmem>>, vector<512x512xf32>
    %cst_8 = arith.constant dense<0.000000e+00> : vector<16x512xf32>
    %11 = tpu.matmul %9, %10, %cst_8 {dimension_numbers = #tpu.dot_dimension_numbers<[1], [0], [0], [1], [0, 0, 1, 1], [], []>} : vector<16x512xf32>, vector<512x512xf32>, vector<16x512xf32> -> vector<16x512xf32>
    %12 = arith.addf %11, %4 : vector<16x512xf32>
    %c0_9 = arith.constant 0 : index
    %c0_10 = arith.constant 0 : index
    %13 = vector.load %arg5[%c0_9, %c0_10] : memref<1x512xf32, #tpu.memory_space<vmem>>, vector<1x512xf32>
    %14 = vector.broadcast %13 : vector<1x512xf32> to vector<16x512xf32>
    %15 = arith.addf %12, %14 : vector<16x512xf32>
    %cst_11 = arith.constant 0.000000e+00 : f32
    %16 = vector.broadcast %cst_11 : f32 to vector<16x512xf32>
    %17 = arith.maximumf %15, %16 : vector<16x512xf32>
    %c0_12 = arith.constant 0 : index
    %c0_13 = arith.constant 0 : index
    %18 = vector.load %arg6[%c0_12, %c0_13] : memref<16x512xf32, #tpu.memory_space<vmem>>, vector<16x512xf32>
    tpu.vector_store %arg6[%c0_12, %c0_13], %17 {strides = array<i32>} : memref<16x512xf32, #tpu.memory_space<vmem>>, vector<16x512xf32>,
    return
  }
  func.func @transform_0(%arg0: i32) -> (i32, i32) {
    %c0_i32 = arith.constant 0 : i32
    %c0_i32_0 = arith.constant 0 : i32
    return %arg0, %c0_i32 : i32, i32
  }
  func.func @transform_1(%arg0: i32) -> (i32, i32) {
    %c0_i32 = arith.constant 0 : i32
    %c0_i32_0 = arith.constant 0 : i32
    %c0_i32_1 = arith.constant 0 : i32
    return %c0_i32, %c0_i32_0 : i32, i32
  }
  func.func @transform_2(%arg0: i32) -> (i32, i32) {
    %c0_i32 = arith.constant 0 : i32
    %c0_i32_0 = arith.constant 0 : i32
    %c0_i32_1 = arith.constant 0 : i32
    return %c0_i32, %c0_i32_0 : i32, i32
  }
  func.func @transform_3(%arg0: i32) -> (i32, i32) {
    %c0_i32 = arith.constant 0 : i32
    %c0_i32_0 = arith.constant 0 : i32
    %c0_i32_1 = arith.constant 0 : i32
    return %c0_i32, %c0_i32_0 : i32, i32
  }
  func.func @transform_4(%arg0: i32) -> (i32, i32) {
    %c0_i32 = arith.constant 0 : i32
    %c0_i32_0 = arith.constant 0 : i32
    %c0_i32_1 = arith.constant 0 : i32
    return %c0_i32, %c0_i32_0 : i32, i32
  }
  func.func @transform_5(%arg0: i32) -> (i32, i32) {
    %c0_i32 = arith.constant 0 : i32
    %c0_i32_0 = arith.constant 0 : i32
    return %arg0, %c0_i32 : i32, i32
  }
}

</mosaic_0001>

<bundles_post_ra>
// kernel: tpu_custom_call.1
= control target key start
LH: loop header
LB: loop body
LE: loop exit
PB: predicated region body
PF: predicated region fallthrough
CT: control target
= control target key end

     0   :  { %10 = vsyncpa [#allocation3], 0  ;;  %s2361_s0 = inlined_call_operand.hbm [shape: f32[32,64], index: 0, kind: input, shape index: {}]   ;;  %s2362_s1 = inlined_call_operand.hbm [shape: f32[64,1024], index: 1, kind: input, shape index: {}]   ;;  %s2363_s2 = inlined_call_operand.hbm [shape: f32[512,512], index: 2, kind: input, shape index: {}]   ;;  %s2364_s3 = inlined_call_operand.vmem [shape: f32[1,512], index: 3, kind: input, shape index: {}]   ;;  %s2365_s4 = inlined_call_operand.vmem [shape: f32[1,512], index: 4, kind: input, shape index: {}]   ;;  %s2366_s5 = inlined_call_operand.hbm [shape: f32[32,512], index: 5, kind: output, shape index: {}]  }
   0x1   :  { %12 = vsyncpa [#allocation3 + $0x1], 0 }
   0x2   :  { %13 = vsyncpa [#allocation6], 0 }
   0x3   :  { %14 = vsyncpa [#allocation4], 0 }
   0x4   :  { %16 = vsyncpa [#allocation4 + $0x1], 0  ;;  %s2053_s18 = smov 0   ;;  %s2055_s19 = smov 0  }
   0x5   :  { %s2057_s20 = smov 0   ;;  %s2059_s21 = smov 0  }
   0x6 LB: > { %s2074_s22 = sadd.s32 4294967295, %s2008_s21   ;;  %s1410_s23 = sadd.s32 4294967294, %s2008_s21   ;;  %s2008_s21 = sphi %s2059_s21, %s2386_s21   ;;  %s2004_s20 = sphi %s2057_s20, %s2385_s20   ;;  %s2000_s19 = sphi %s2055_s19, %s2384_s19   ;;  %s1996_s18 = sphi %s2053_s18, %s2383_s18  }
   0x7   : > { %p42_p0 = scmp.ne.s32.totalorder %s2000_s19, %s1996_s18  ;;  %p2367_p1 = scmp.eq.s32.totalorder %s2074_s22, 0 }
   0x8   : > { %p156_p3 = scmp.eq.s32.totalorder %s1410_s23, 1  ;;  %p1411_p5 = scmp.ge.s32.totalorder %s2008_s21, 1 }
   0x9   : > { %p2083_p4 = por %p2367_p1, %p42_p0  ;;  %p163_p7 = scmp.lt.s32.totalorder %s2008_s21, 3 }
   0xa   : > { %p2088_p6 = por %p156_p3, %p42_p0  ;;  %s2010_s27 = smov [#allocation5]  }
   0xb   : > { %s2370_s24 = scalar_select %p2083_p4, 1, 0 }
   0xc   : > { %s2371_s25 = scalar_select %p2088_p6, 1, 0 }
   0xd   : > { %p2093_p8 = pnand %p1411_p5, %p163_p7  ;;  %s175_s28 = sshll.u32 %s2010_s27, 4  ;;  %s2097_s28 = int_to_ptr.vmem [resolvable:$true] %s175_s28 }
   0xe   : > { %s2011_s30 = smov [#allocation7]   ;;  %s1852_s9 = scalar_lea.hbm %s2362_s1, 8192 }
   0xf   : > { %p1788_p9 = pneg %p2093_p8  ;;  %s188_s6 = sshll.u32 %s2011_s30, 4  ;;  %s2108_s6 = int_to_ptr.vmem [resolvable:$true] %s188_s6 }
  0x10   : > { %p1853_p12 = scmp.ne.s32.totalorder %s2362_s1, %s1852_s9  ;;  %p1859_p5 = scmp.lt.u32.totalorder %s1852_s9, %s2362_s1 }
  0x11   : > { %p2104_p11 = pnand %p1788_p9, %p2367_p1 }
  0x13   : > { %p1854_p13 = pneg %p2104_p11 }
  0x15   : > { %p1855_p0 = pnand %p1854_p13, %p1853_p12 }
  0x17   : > { %p1856_p3 = pneg %p1855_p0 }
  0x19   : > { %p1861_p7 = pnand %p1859_p5, %p1856_p3 }
  0x1b   : > { %1864 = shalt.err (!%p1861_p7)
}
  0x1c   : > { %s1865_s14 = scalar_lea.vmem %s2097_s28, 8192  ;;  %p1873_p2 = scmp.lt.s32.totalorder %s2097_s28, %s2097_s28 }
  0x1d   : > { %p1866_p9 = scmp.ne.s32.totalorder %s2097_s28, %s1865_s14  ;;  %p1874_p12 = scmp.lt.s32.totalorder %s1865_s14, %s1865_s14 }
  0x1f   : > { %p1868_p10 = pnand %p1866_p9, %p1854_p13  ;;  %p1875_p0 = por %p1874_p12, %p1873_p2 }
  0x21   : > { %p1869_p1 = pneg %p1868_p10 }
  0x23   : > { %p1876_p6 = pnand %p1875_p0, %p1869_p1 }
  0x25   : > { %1879 = shalt.err (!%p1876_p6)
}
  0x26   : > { %s2012_s15 = smov 1024   ;;  %s2013_s16 = smov 64  }
  0x27   : > { %1791 = dma.hbm_to_vmem [thread:$0]  (!%p2104_p11), %s2362_s1, 8192, %s2097_s28, [#allocation6], %s2012_s15, %s2012_s15, %s2013_s16  }
  0x28   : > { %s1880_s7 = scalar_lea.hbm %s2363_s2, 32768 }
  0x29   : > { %p1881_p2 = scmp.ne.s32.totalorder %s2363_s2, %s1880_s7  ;;  %p1887_p10 = scmp.lt.u32.totalorder %s1880_s7, %s2363_s2 }
  0x2b   : > { %p1883_p1 = pnand %p1881_p2, %p1854_p13 }
  0x2d   : > { %p1884_p6 = pneg %p1883_p1 }
  0x2f   : > { %p1889_p3 = pnand %p1887_p10, %p1884_p6 }
  0x31   : > { %1892 = shalt.err (!%p1889_p3)
}
  0x32   : > { %s1893_s28 = scalar_lea.vmem %s2108_s6, 32768  ;;  %p1901_p12 = scmp.lt.s32.totalorder %s2108_s6, %s2108_s6 }
  0x33   : > { %p1894_p5 = scmp.ne.s32.totalorder %s2108_s6, %s1893_s28  ;;  %p1902_p0 = scmp.lt.s32.totalorder %s1893_s28, %s1893_s28 }
  0x35   : > { %p1896_p7 = pnand %p1894_p5, %p1854_p13  ;;  %p1903_p2 = por %p1902_p0, %p1901_p12 }
  0x37   : > { %p1897_p9 = pneg %p1896_p7 }
  0x39   : > { %p1904_p1 = pnand %p1903_p2, %p1897_p9 }
  0x3b   : > { %1907 = shalt.err (!%p1904_p1)
}
  0x3c   : > { %s2014_s12 = smov 512   ;;  %s2015_s13 = smov 32  }
  0x3d   : > { %1794 = dma.hbm_to_vmem [thread:$0]  (!%p2104_p11), %s2363_s2, 32768, %s2108_s6, [#allocation6], %s2014_s12, %s2014_s12, %s2015_s13  }
  0x3e   : > { %s2163_s16 = sadd.s32 1, %s2008_s21   ;;  %s29_s23 = sadd.s32 1, %s2004_s20 }
  0x3f   : > { %s26_s17 = ssub.s32 %s2008_s21, %s2163_s16  ;;  %p36_p6 = scmp.ne.s32.totalorder %s2004_s20, %s2000_s19 }
  0x40   : > { %p27_p13 = scmp.eq.s32.totalorder %s26_s17, 0  ;;  %p37_p10 = scmp.eq.s32.totalorder %s2008_s21, 0 }
  0x41   : > { %p2374_p5 = scmp.eq.s32.totalorder %s2074_s22, 1  ;;  %p1805_p9 = scmp.lt.s32.totalorder %s2008_s21, 2 }
  0x42   : > { %s2172_s27 = scalar_select %p27_p13, %s2004_s20, %s29_s23  }
  0x43   : > { %p38_p3 = por %p37_p10, %p36_p6  ;;  %p2176_p7 = por %p2374_p5, %p36_p6 }
  0x44   : > { %s208_s29 = sand.u32 1, %s2004_s20   ;;  %s1437_s6 = sshll.u32 %s2008_s21, 8 }
  0x45   : > { %s2375_s30 = scalar_select %p2176_p7, 1, 0 }
  0x46   : > { %s1415_s7 = sshll.u32 %s208_s29, 4  ;;  %s2186_s10 = scalar_lea.hbm %s2361_s0, %s1437_s6 }
  0x47   : > { %s212_s11 = scalar_lea.vmem [#allocation2], %s1415_s7  ;;  %p2190_p11 = pnand %p1805_p9, %p38_p3 }
  0x48   : > { %s219_s28 = sshll.u32 %s212_s11, 4  ;;  %s2194_s13 = scalar_lea.sflag [#allocation3], %s208_s29  ;;  %s2188_s28 = int_to_ptr.vmem [resolvable:$true] %s219_s28 }
  0x49   : > { %s1908_s14 = scalar_lea.hbm %s2186_s10, 256  ;;  %p1910_p0 = pneg %p2190_p11 }
  0x4a   : > { %p1909_p12 = scmp.ne.s32.totalorder %s2186_s10, %s1908_s14  ;;  %s1913_s23 = scalar_lea.hbm %s2361_s0, 512 }
  0x4b   : > { %p1914_p13 = scmp.lt.u32.totalorder %s2186_s10, %s2361_s0  ;;  %p1915_p6 = scmp.lt.u32.totalorder %s1913_s23, %s1908_s14 }
  0x4c   : > { %p1911_p2 = pnand %p1910_p0, %p1909_p12  ;;  %p1917_p3 = scmp.lt.u32.totalorder %s1908_s14, %s2186_s10 }
  0x4d   : > { %p1916_p10 = por %p1915_p6, %p1914_p13 }
  0x4e   : > { %p1912_p1 = pneg %p1911_p2 }
  0x4f   : > { %p1918_p5 = por %p1917_p3, %p1916_p10 }
  0x51   : > { %p1919_p9 = pnand %p1918_p5, %p1912_p1 }
  0x53   : > { %1922 = shalt.err (!%p1919_p9)
}
  0x54   : > { %s1923_s29 = scalar_lea.vmem %s2188_s28, 256  ;;  %s2016_s8 = smov [#allocation2]  }
  0x55   : > { %p1924_p12 = scmp.ne.s32.totalorder %s2188_s28, %s1923_s29  ;;  %s1928_s9 = sshll.u32 %s2016_s8, 4  ;;  %s1929_s9 = int_to_ptr.vmem [resolvable:$false] %s1928_s9 }
  0x56   : > { %s1930_s11 = scalar_lea.vmem %s1929_s9, 512  ;;  %p1931_p4 = scmp.lt.s32.totalorder %s2188_s28, %s1929_s9 }
  0x57   : > { %p1926_p2 = pnand %p1924_p12, %p1910_p0  ;;  %p1932_p13 = scmp.lt.s32.totalorder %s1930_s11, %s1923_s29 }
  0x59   : > { %p1927_p7 = pneg %p1926_p2  ;;  %p1933_p6 = por %p1932_p13, %p1931_p4 }
  0x5b   : > { %p1934_p10 = pnand %p1933_p6, %p1927_p7 }
  0x5d   : > { %1937 = shalt.err (!%p1934_p10)
}
  0x5e   : > { %s2017_s14 = smov 128   ;;  %s2018_s15 = smov 8  }
  0x5f   : > { %1798 = dma.hbm_to_vmem [thread:$0]  (!%p2190_p11), %s2186_s10, 256, %s2188_s28, %s2194_s13, %s2017_s14, %s2017_s14, %s2018_s15  }
  0x60   : > { %231 = sbr.rel (%p2093_p8) target bundleno = 645 (0x285), region = 40  ;;  %s2225_s17 = sand.u32 (!%p2093_p8), 1, %s2000_s19  }
  0x61   : > { %s1419_s23 = sshll.u32 (!%p2093_p8), %s2225_s17, 4  ;;  %s234_s7 = scalar_lea.sflag (!%p2093_p8), [#allocation3], %s2225_s17 }
  0x62   : > { %s2229_s6 = scalar_lea.vmem (!%p2093_p8), [#allocation2], %s1419_s23  ;;  %p2377_p4 = scmp.ne.s32.totalorder (!%p2093_p8), %s2370_s24, 0 }
  0x67   : > { %1983 = dma.done.wait (%p2377_p4), %s234_s7, 256  }
  0x68   : > { %1985 = vsyncadd (%p2377_p4), %s234_s7, 4294967040  ;;  %p2378_p7 = scmp.eq.s32.totalorder %s2074_s22, 0 }
  0x6a   : > { %1987 = dma.done.wait (%p2378_p7), [#allocation6], 40960   ;;  %p2379_p8 = pmov %p2378_p7 }
  0x6b   : > { %v2019_v0 = vmov 0.0   ;;  %v277_v1 = vld [vmem:[#allocation5 + $0x8] sm:$0xff]  ;;  %v276_v3 = vld [vmem:[#allocation5] sm:$0xff]  ;;  %v279_v20 = vld [vmem:[#allocation5 + $0x18] sm:$0xff]  ;;  %vm340_vm0 = vcmask 523264   ;;  %s1422_s12 = sshll.u32 %s2225_s17, 6 }
  0x6c   : > { %1989 = vsyncadd (%p2379_p8), [#allocation6], 4294926336  ;;  %411 = vmatprep.mubr.f32.mxu0 %v2019_v0  ;;  %488 = vmatprep.mubr.f32.mxu1 %v2019_v0  ;;  %v285_v2 = vld [vmem:[#allocation5 + $0x48] sm:$0xff]  ;;  %v284_v5 = vld [vmem:[#allocation5 + $0x40] sm:$0xff]  ;;  %s271_s13 = scalar_lea.vmem [#allocation8], %s1422_s12  ;;  %s1439_s8 = sshll.u32 %s2074_s22, 10 }
  0x6d   : > { %v1440_v4 = vpack.c.bf16 %v285_v2, %v277_v1  ;;  %v293_v6 = vld [vmem:[#allocation5 + $0x88] sm:$0xff]  ;;  %v1442_v8 = vpack.c.bf16 %v284_v5, %v276_v3  ;;  %v292_v10 = vld [vmem:[#allocation5 + $0x80] sm:$0xff]  ;;  %v287_v21 = vld [vmem:[#allocation5 + $0x58] sm:$0xff]  ;;  %s1318_s29 = sshll.u32 %s271_s13, 4  ;;  %s2317_s11 = scalar_lea.hbm %s2366_s5, %s1439_s8  ;;  %s2312_s29 = int_to_ptr.vmem [resolvable:$true] %s1318_s29 }
  0x6e   : > { %v301_v7 = vld [vmem:[#allocation5 + $0xc8] sm:$0xff]  ;;  %v300_v11 = vld [vmem:[#allocation5 + $0xc0] sm:$0xff]  ;;  %v278_v22 = vld [vmem:[#allocation5 + $0x10] sm:$0xff]  ;;  %v1456_v24 = vpack.c.bf16 %v287_v21, %v279_v20  ;;  %s1304_s14 = scalar_lea.sflag [#allocation4], %s2225_s17  ;;  %s1938_s15 = scalar_lea.vmem %s2312_s29, 1024 }
  0x6f   : > { %v1444_v9 = vpack.c.bf16 %v301_v7, %v293_v6  ;;  %v309_v12 = vld [vmem:[#allocation5 + $0x108] sm:$0xff]  ;;  %1441 = vmatprep.subr.bf16.mxu0 %v1440_v4  ;;  %v1446_v14 = vpack.c.bf16 %v300_v11, %v292_v10  ;;  %v308_v15 = vld [vmem:[#allocation5 + $0x100] sm:$0xff]  ;;  %v286_v23 = vld [vmem:[#allocation5 + $0x50] sm:$0xff]  ;;  %p1939_p11 = scmp.ne.s32.totalorder %s2312_s29, %s1938_s15  ;;  %p2380_p0 = scmp.ne.s32.totalorder %s2375_s30, 0 }
  0x70   : > { %v317_v13 = vld [vmem:[#allocation5 + $0x148] sm:$0xff]  ;;  %1443 = vmatpush1.bf16.msra.mxu0 %v1442_v8  ;;  %v316_v16 = vld [vmem:[#allocation5 + $0x140] sm:$0xff]  ;;  %v1458_v25 = vpack.c.bf16 %v286_v23, %v278_v22  ;;  %v295_v26 = vld [vmem:[#allocation5 + $0x98] sm:$0xff]  ;;  %1457 = vmatprep.subr.bf16.mxu1 %v1456_v24  ;;  %s2020_s23 = smov [#allocation8]  }
  0x71   : > { %1445 = vmatprep.subr.bf16.mxu0 %v1444_v9  ;;  %v1448_v17 = vpack.c.bf16 %v317_v13, %v309_v12  ;;  %v325_v18 = vld [vmem:[#allocation5 + $0x188] sm:$0xff]  ;;  %v303_v27 = vld [vmem:[#allocation5 + $0xd8] sm:$0xff]  ;;  %v294_v28 = vld [vmem:[#allocation5 + $0x90] sm:$0xff]  ;;  %v1450_v29 = vpack.c.bf16 %v316_v16, %v308_v15  ;;  %p1940_p1 = pnand %p1939_p11, %p2380_p0  ;;  %s1942_s7 = sshll.u32 %s2020_s23, 4  ;;  %s1943_s7 = int_to_ptr.vmem [resolvable:$false] %s1942_s7 }
  0x72   : > { %v333_v19 = vld [vmem:[#allocation5 + $0x1c8] sm:$0xff]  ;;  %v1460_v30 = vpack.c.bf16 %v303_v27, %v295_v26  ;;  %v302_v31 = vld [vmem:[#allocation5 + $0xd0] sm:$0xff]  ;;  %v311_v32 = vld [vmem:[#allocation5 + $0x118] sm:$0xff]  ;;  %1459 = vmatpush1.bf16.msra.mxu1 %v1458_v25  ;;  %p1945_p5 = scmp.lt.s32.totalorder %s2312_s29, %s1943_s7 }
  0x73   : > { %v319_v33 = vld [vmem:[#allocation5 + $0x158] sm:$0xff]  ;;  %v1452_v34 = vpack.c.bf16 %v333_v19, %v325_v18  ;;  %v324_v35 = vld [vmem:[#allocation5 + $0x180] sm:$0xff]  ;;  %v1462_v37 = vpack.c.bf16 %v302_v31, %v294_v28  ;;  %v310_v38 = vld [vmem:[#allocation5 + $0x110] sm:$0xff]  ;;  %p1941_p3 = pneg %p1940_p1 }
  0x74   : > { %1447 = vmatpush1.bf16.msra.mxu0 %v1446_v14  ;;  %v332_v36 = vld [vmem:[#allocation5 + $0x1c0] sm:$0xff]  ;;  %1461 = vmatprep.subr.bf16.mxu1 %v1460_v30  ;;  %v1464_v39 = vpack.c.bf16 %v319_v33, %v311_v32  ;;  %v318_v40 = vld [vmem:[#allocation5 + $0x150] sm:$0xff]  ;;  %v281_v41 = vld [vmem:[#allocation5 + $0x28] sm:$0xff] }
  0x75   : > { %1449 = vmatprep.subr.bf16.mxu0 %v1448_v17  ;;  %v289_v42 = vld [vmem:[#allocation5 + $0x68] sm:$0xff]  ;;  %v1454_v43 = vpack.c.bf16 %v332_v36, %v324_v35  ;;  %v327_v44 = vld [vmem:[#allocation5 + $0x198] sm:$0xff]  ;;  %v280_v47 = vld [vmem:[#allocation5 + $0x20] sm:$0xff]  ;;  %v1466_v49 = vpack.c.bf16 %v318_v40, %v310_v38 }
  0x76   : > { %v335_v45 = vld [vmem:[#allocation5 + $0x1d8] sm:$0xff]  ;;  %v1472_v46 = vpack.c.bf16 %v289_v42, %v281_v41  ;;  %v288_v48 = vld [vmem:[#allocation5 + $0x60] sm:$0xff]  ;;  %1463 = vmatpush1.bf16.msra.mxu1 %v1462_v37  ;;  %v297_v50 = vld [vmem:[#allocation5 + $0xa8] sm:$0xff] }
  0x77   : > { %v305_v51 = vld [vmem:[#allocation5 + $0xe8] sm:$0xff]  ;;  %1465 = vmatprep.subr.bf16.mxu1 %v1464_v39  ;;  %v1468_v52 = vpack.c.bf16 %v335_v45, %v327_v44  ;;  %v326_v53 = vld [vmem:[#allocation5 + $0x190] sm:$0xff]  ;;  %v283_v56 = vld [vmem:[#allocation5 + $0x38] sm:$0xff]  ;;  %v1474_v58 = vpack.c.bf16 %v288_v48, %v280_v47 }
  0x78   : > { %1451 = vmatpush1.bf16.msra.mxu0 %v1450_v29  ;;  %v334_v54 = vld [vmem:[#allocation5 + $0x1d0] sm:$0xff]  ;;  %v291_v57 = vld [vmem:[#allocation5 + $0x78] sm:$0xff]  ;;  %v1476_v59 = vpack.c.bf16 %v305_v51, %v297_v50  ;;  %v296_v60 = vld [vmem:[#allocation5 + $0xa0] sm:$0xff] }
  0x79   : > { %1453 = vmatprep.subr.bf16.mxu0 %v1452_v34  ;;  %v2242_v55 = vld [vmem:[%s2229_s6] sm:$0xff]  ;;  %v1470_v62 = vpack.c.bf16 %v334_v54, %v326_v53  ;;  %v313_v63 = vld [vmem:[#allocation5 + $0x128] sm:$0xff]  ;;  %v1488_v2 = vpack.c.bf16 %v291_v57, %v283_v56  ;;  %v299_v6 = vld [vmem:[#allocation5 + $0xb8] sm:$0xff] }
  0x7a   : > { %v304_v61 = vld [vmem:[#allocation5 + $0xe0] sm:$0xff]  ;;  %1467 = vmatpush1.bf16.msra.mxu1 %v1466_v49  ;;  %v321_v1 = vld [vmem:[#allocation5 + $0x168] sm:$0xff]  ;;  %v282_v3 = vld [vmem:[#allocation5 + $0x30] sm:$0xff] }
  0x7b   : > { %1469 = vmatprep.subr.bf16.mxu1 %v1468_v52  ;;  %v290_v4 = vld [vmem:[#allocation5 + $0x70] sm:$0xff]  ;;  %v2248_v5 = vld [vmem:[%s2229_s6 + $0x8] sm:$0xff]  ;;  %v1478_v8 = vpack.c.bf16 %v304_v61, %v296_v60  ;;  %v1480_v9 = vpack.c.bf16 %v321_v1, %v313_v63  ;;  %v312_v10 = vld [vmem:[#allocation5 + $0x120] sm:$0xff]  ;;  %s1944_s6 = scalar_lea.vmem %s1943_s7, 2048 }
  0x7c   : > { %1455 = vmatpush1.bf16.msra.mxu0 %v1454_v43  ;;  %v307_v7 = vld [vmem:[#allocation5 + $0xf8] sm:$0xff]  ;;  %v320_v11 = vld [vmem:[#allocation5 + $0x160] sm:$0xff]  ;;  %v1490_v12 = vpack.c.bf16 %v290_v4, %v282_v3  ;;  %v329_v13 = vld [vmem:[#allocation5 + $0x1a8] sm:$0xff]  ;;  %p1946_p9 = scmp.lt.s32.totalorder %s1944_s6, %s1938_s15 }
  0x7d   : > { %1473 = vmatprep.subr.bf16.mxu0 %v1472_v46  ;;  %v337_v14 = vld [vmem:[#allocation5 + $0x1e8] sm:$0xff]  ;;  %v1492_v15 = vpack.c.bf16 %v307_v7, %v299_v6  ;;  %v298_v16 = vld [vmem:[#allocation5 + $0xb0] sm:$0xff]  ;;  %v315_v18 = vld [vmem:[#allocation5 + $0x138] sm:$0xff]  ;;  %v1482_v20 = vpack.c.bf16 %v320_v11, %v312_v10 }
  0x7e   : > { %1471 = vmatpush1.bf16.msra.mxu1 %v1470_v62  ;;  %v306_v17 = vld [vmem:[#allocation5 + $0xf0] sm:$0xff]  ;;  %v323_v19 = vld [vmem:[#allocation5 + $0x178] sm:$0xff]  ;;  %v1484_v21 = vpack.c.bf16 %v337_v14, %v329_v13  ;;  %v328_v22 = vld [vmem:[#allocation5 + $0x1a0] sm:$0xff]  ;;  %p1947_p12 = por %p1946_p9, %p1945_p5 }
  0x7f   : > { %1423 = vmatmul.mubr.msk.f32.vlgmr.msra.gmra.mrb[0].mxu0 %vm340_vm0, %v2242_v55  ;;  %1489 = vmatprep.subr.bf16.mxu1 %v1488_v2  ;;  %v336_v23 = vld [vmem:[#allocation5 + $0x1e0] sm:$0xff]  ;;  %v1494_v24 = vpack.c.bf16 %v306_v17, %v298_v16  ;;  %v694_v25 = vld [vmem:[#allocation7 + $0x8] sm:$0xff]  ;;  %v1496_v27 = vpack.c.bf16 %v323_v19, %v315_v18  ;;  %v314_v28 = vld [vmem:[#allocation5 + $0x130] sm:$0xff] }
  0x80   : > { %417 = vmatprep.mubr.f32.mxu0 %v2019_v0  ;;  %1475 = vmatpush1.bf16.msra.mxu0 %v1474_v58  ;;  %v698_v26 = vld [vmem:[#allocation7 + $0x28] sm:$0xff]  ;;  %v322_v29 = vld [vmem:[#allocation5 + $0x170] sm:$0xff]  ;;  %v331_v30 = vld [vmem:[#allocation5 + $0x1b8] sm:$0xff]  ;;  %v1486_v32 = vpack.c.bf16 %v336_v23, %v328_v22  ;;  %p1948_p2 = pnand %p1947_p12, %p1941_p3 }
  0x81   : > { %1477 = vmatprep.subr.bf16.mxu0 %v1476_v59  ;;  %1425 = vmatmul.mubr.msk.f32.vlgmr.msra.gmra.mrb[0].mxu1 %vm340_vm0, %v2242_v55  ;;  %v339_v31 = vld [vmem:[#allocation5 + $0x1f8] sm:$0xff]  ;;  %v1504_v33 = vpack.c.bf16 %v698_v26, %v694_v25  ;;  %v693_v34 = vld [vmem:[#allocation7] sm:$0xff]  ;;  %v1498_v36 = vpack.c.bf16 %v322_v29, %v314_v28  ;;  %v702_v37 = vld [vmem:[#allocation7 + $0x48] sm:$0xff] }
  0x82   : > { %494 = vmatprep.mubr.f32.mxu1 %v2019_v0  ;;  %1491 = vmatpush1.bf16.msra.mxu1 %v1490_v12  ;;  %v697_v35 = vld [vmem:[#allocation7 + $0x20] sm:$0xff]  ;;  %v706_v38 = vld [vmem:[#allocation7 + $0x68] sm:$0xff]  ;;  %v1500_v39 = vpack.c.bf16 %v339_v31, %v331_v30  ;;  %v330_v40 = vld [vmem:[#allocation5 + $0x1b0] sm:$0xff] }
  0x83   : > { %1424 = vmatmul.mubr.msk.f32.gmra.mrb[2].mxu0 %vm340_vm0, %v2248_v5  ;;  %1493 = vmatprep.subr.bf16.mxu1 %v1492_v15  ;;  %v338_v41 = vld [vmem:[#allocation5 + $0x1f0] sm:$0xff]  ;;  %v696_v42 = vld [vmem:[#allocation7 + $0x18] sm:$0xff]  ;;  %v1506_v44 = vpack.c.bf16 %v697_v35, %v693_v34  ;;  %v1508_v45 = vpack.c.bf16 %v706_v38, %v702_v37  ;;  %v701_v46 = vld [vmem:[#allocation7 + $0x40] sm:$0xff] }
  0x84   : > { %1479 = vmatpush1.bf16.msra.mxu0 %v1478_v8  ;;  %565 = vmatprep.mubr.f32.mxu0 %v2019_v0  ;;  %v700_v43 = vld [vmem:[#allocation7 + $0x38] sm:$0xff]  ;;  %v705_v47 = vld [vmem:[#allocation7 + $0x60] sm:$0xff]  ;;  %v1502_v48 = vpack.c.bf16 %v338_v41, %v330_v40  ;;  %v710_v49 = vld [vmem:[#allocation7 + $0x88] sm:$0xff] }
  0x85   : > { %1481 = vmatprep.subr.bf16.mxu0 %v1480_v9  ;;  %1426 = vmatmul.mubr.msk.f32.gmra.mrb[2].mxu1 %vm340_vm0, %v2248_v5  ;;  %v714_v50 = vld [vmem:[#allocation7 + $0xa8] sm:$0xff]  ;;  %v1632_v51 = vpack.c.bf16 %v700_v43, %v696_v42  ;;  %v695_v52 = vld [vmem:[#allocation7 + $0x10] sm:$0xff]  ;;  %v704_v54 = vld [vmem:[#allocation7 + $0x58] sm:$0xff]  ;;  %v1510_v57 = vpack.c.bf16 %v705_v47, %v701_v46 }
  0x86   : > { %1495 = vmatpush1.bf16.msra.mxu1 %v1494_v24  ;;  %642 = vmatprep.mubr.f32.mxu1 %v2019_v0  ;;  %v699_v53 = vld [vmem:[#allocation7 + $0x30] sm:$0xff]  ;;  %v708_v56 = vld [vmem:[#allocation7 + $0x78] sm:$0xff]  ;;  %v1512_v58 = vpack.c.bf16 %v714_v50, %v710_v49  ;;  %v709_v59 = vld [vmem:[#allocation7 + $0x80] sm:$0xff] }
  0x87   : > { %1497 = vmatprep.subr.bf16.mxu1 %v1496_v27  ;;  %v713_v60 = vld [vmem:[#allocation7 + $0xa0] sm:$0xff]  ;;  %v1634_v61 = vpack.c.bf16 %v699_v53, %v695_v52  ;;  %v718_v62 = vld [vmem:[#allocation7 + $0xc8] sm:$0xff]  ;;  %v1636_v1 = vpack.c.bf16 %v708_v56, %v704_v54  ;;  %v703_v2 = vld [vmem:[#allocation7 + $0x50] sm:$0xff] }
  0x88   : > { %1483 = vmatpush1.bf16.msra.mxu0 %v1482_v20  ;;  %v722_v63 = vld [vmem:[#allocation7 + $0xe8] sm:$0xff]  ;;  %v707_v3 = vld [vmem:[#allocation7 + $0x70] sm:$0xff]  ;;  %v712_v4 = vld [vmem:[#allocation7 + $0x98] sm:$0xff]  ;;  %v1514_v7 = vpack.c.bf16 %v713_v60, %v709_v59 }
  0x89   : > { %1485 = vmatprep.subr.bf16.mxu0 %v1484_v21  ;;  %v716_v6 = vld [vmem:[#allocation7 + $0xb8] sm:$0xff]  ;;  %v1516_v8 = vpack.c.bf16 %v722_v63, %v718_v62  ;;  %v717_v9 = vld [vmem:[#allocation7 + $0xc0] sm:$0xff]  ;;  %v1638_v11 = vpack.c.bf16 %v707_v3, %v703_v2  ;;  %v726_v12 = vld [vmem:[#allocation7 + $0x108] sm:$0xff] }
  0x8a   : > { %1499 = vmatpush1.bf16.msra.mxu1 %v1498_v36  ;;  %v721_v10 = vld [vmem:[#allocation7 + $0xe0] sm:$0xff]  ;;  %v730_v13 = vld [vmem:[#allocation7 + $0x128] sm:$0xff]  ;;  %v1640_v14 = vpack.c.bf16 %v716_v6, %v712_v4  ;;  %v711_v15 = vld [vmem:[#allocation7 + $0x90] sm:$0xff] }
  0x8b   : > { %1501 = vmatprep.subr.bf16.mxu1 %v1500_v39  ;;  %v715_v16 = vld [vmem:[#allocation7 + $0xb0] sm:$0xff]  ;;  %v720_v17 = vld [vmem:[#allocation7 + $0xd8] sm:$0xff]  ;;  %v1518_v19 = vpack.c.bf16 %v721_v10, %v717_v9  ;;  %v725_v20 = vld [vmem:[#allocation7 + $0x100] sm:$0xff] }
  0x8c   : > { %1487 = vmatpush1.bf16.msra.mxu0 %v1486_v32  ;;  %v724_v18 = vld [vmem:[#allocation7 + $0xf8] sm:$0xff]  ;;  %v729_v21 = vld [vmem:[#allocation7 + $0x120] sm:$0xff]  ;;  %v1642_v22 = vpack.c.bf16 %v715_v16, %v711_v15  ;;  %v734_v23 = vld [vmem:[#allocation7 + $0x148] sm:$0xff] }
  0x8d   : > { %1505 = vmatprep.subr.bf16.mxu0 %v1504_v33  ;;  %v738_v24 = vld [vmem:[#allocation7 + $0x168] sm:$0xff]  ;;  %v719_v25 = vld [vmem:[#allocation7 + $0xd0] sm:$0xff]  ;;  %v728_v27 = vld [vmem:[#allocation7 + $0x118] sm:$0xff]  ;;  %v1522_v29 = vpack.c.bf16 %v729_v21, %v725_v20 }
  0x8e   : > { %1503 = vmatpush1.bf16.msra.mxu1 %v1502_v48  ;;  %v723_v26 = vld [vmem:[#allocation7 + $0xf0] sm:$0xff]  ;;  %v732_v28 = vld [vmem:[#allocation7 + $0x138] sm:$0xff]  ;;  %v1524_v30 = vpack.c.bf16 %v738_v24, %v734_v23  ;;  %v733_v31 = vld [vmem:[#allocation7 + $0x140] sm:$0xff] }
  0x8f   : > { %1427 = vmatmul.mubr.msk.f32.vlgmr.msra.gmra.mrb[4].mxu0 %vm340_vm0, %v2242_v55  ;;  %1633 = vmatprep.subr.bf16.mxu1 %v1632_v51  ;;  %v737_v32 = vld [vmem:[#allocation7 + $0x160] sm:$0xff]  ;;  %v1646_v33 = vpack.c.bf16 %v723_v26, %v719_v25  ;;  %v742_v34 = vld [vmem:[#allocation7 + $0x188] sm:$0xff]  ;;  %v1648_v35 = vpack.c.bf16 %v732_v28, %v728_v27  ;;  %v727_v36 = vld [vmem:[#allocation7 + $0x110] sm:$0xff] }
  0x90   : > { %1507 = vmatpush1.bf16.msra.mxu0 %v1506_v44  ;;  %571 = vmatprep.mubr.f32.mxu0 %v2019_v0  ;;  %v731_v37 = vld [vmem:[#allocation7 + $0x130] sm:$0xff]  ;;  %v736_v38 = vld [vmem:[#allocation7 + $0x158] sm:$0xff]  ;;  %v1526_v40 = vpack.c.bf16 %v737_v32, %v733_v31  ;;  %v741_v42 = vld [vmem:[#allocation7 + $0x180] sm:$0xff] }
  0x91   : > { %1509 = vmatprep.subr.bf16.mxu0 %v1508_v45  ;;  %1429 = vmatmul.mubr.msk.f32.vlgmr.msra.gmra.mrb[4].mxu1 %vm340_vm0, %v2242_v55  ;;  %v1520_v55 = vpack.c.bf16 %v730_v13, %v726_v12  ;;  %v740_v39 = vld [vmem:[#allocation7 + $0x178] sm:$0xff]  ;;  %v745_v43 = vld [vmem:[#allocation7 + $0x1a0] sm:$0xff]  ;;  %v1650_v44 = vpack.c.bf16 %v731_v37, %v727_v36  ;;  %v750_v45 = vld [vmem:[#allocation7 + $0x1c8] sm:$0xff] }
  0x92   : > { %1635 = vmatpush1.bf16.msra.mxu1 %v1634_v61  ;;  %648 = vmatprep.mubr.f32.mxu1 %v2019_v0  ;;  %v1644_v0 = vpack.c.bf16 %v724_v18, %v720_v17  ;;  %v754_v46 = vld [vmem:[#allocation7 + $0x1e8] sm:$0xff]  ;;  %v1652_v47 = vpack.c.bf16 %v740_v39, %v736_v38  ;;  %v735_v48 = vld [vmem:[#allocation7 + $0x150] sm:$0xff]  ;;  %v744_v50 = vld [vmem:[#allocation7 + $0x198] sm:$0xff]  ;;  %v1530_v52 = vpack.c.bf16 %v745_v43, %v741_v42 }
  0x93   : > { %1428 = vmatmul.mubr.msk.f32.gmra.mrb[6].mxu0 %vm340_vm0, %v2248_v5  ;;  %1637 = vmatprep.subr.bf16.mxu1 %v1636_v1  ;;  %v739_v49 = vld [vmem:[#allocation7 + $0x170] sm:$0xff]  ;;  %v748_v51 = vld [vmem:[#allocation7 + $0x1b8] sm:$0xff]  ;;  %v1532_v53 = vpack.c.bf16 %v754_v46, %v750_v45  ;;  %v749_v54 = vld [vmem:[#allocation7 + $0x1c0] sm:$0xff] }
  0x94   : > { %1511 = vmatpush1.bf16.msra.mxu0 %v1510_v57  ;;  %v753_v56 = vld [vmem:[#allocation7 + $0x1e0] sm:$0xff]  ;;  %v1654_v57 = vpack.c.bf16 %v739_v49, %v735_v48  ;;  %v762_v59 = vld [vmem:[#allocation7 + $0x228] sm:$0xff]  ;;  %v1656_v60 = vpack.c.bf16 %v748_v51, %v744_v50  ;;  %v743_v61 = vld [vmem:[#allocation7 + $0x190] sm:$0xff] }
  0x95   : > { %1513 = vmatprep.subr.bf16.mxu0 %v1512_v58  ;;  %1430 = vmatmul.mubr.msk.f32.gmra.mrb[6].mxu1 %vm340_vm0, %v2248_v5  ;;  %v746_v5 = vld [vmem:[#allocation7 + $0x1a8] sm:$0xff]  ;;  %v747_v62 = vld [vmem:[#allocation7 + $0x1b0] sm:$0xff]  ;;  %v752_v63 = vld [vmem:[#allocation7 + $0x1d8] sm:$0xff]  ;;  %v1534_v2 = vpack.c.bf16 %v753_v56, %v749_v54 }
  0x96   : > { %1639 = vmatpush1.bf16.msra.mxu1 %v1638_v11  ;;  %v1528_v41 = vpack.c.bf16 %v746_v5, %v742_v34  ;;  %v758_v58 = vld [vmem:[#allocation7 + $0x208] sm:$0xff]  ;;  %v756_v1 = vld [vmem:[#allocation7 + $0x1f8] sm:$0xff]  ;;  %v757_v4 = vld [vmem:[#allocation7 + $0x200] sm:$0xff] }
  0x97   : > { %1641 = vmatprep.subr.bf16.mxu1 %v1640_v14  ;;  %v1536_v3 = vpack.c.bf16 %v762_v59, %v758_v58  ;;  %v761_v6 = vld [vmem:[#allocation7 + $0x220] sm:$0xff]  ;;  %v770_v9 = vld [vmem:[#allocation7 + $0x268] sm:$0xff]  ;;  %v1660_v10 = vpack.c.bf16 %v756_v1, %v752_v63  ;;  %v751_v11 = vld [vmem:[#allocation7 + $0x1d0] sm:$0xff] }
  0x98   : > { %1515 = vmatpush1.bf16.msra.mxu0 %v1514_v7  ;;  %v1658_v7 = vpack.c.bf16 %v747_v62, %v743_v61  ;;  %v755_v12 = vld [vmem:[#allocation7 + $0x1f0] sm:$0xff]  ;;  %v760_v13 = vld [vmem:[#allocation7 + $0x218] sm:$0xff]  ;;  %v1538_v15 = vpack.c.bf16 %v761_v6, %v757_v4  ;;  %v765_v17 = vld [vmem:[#allocation7 + $0x240] sm:$0xff] }
  0x99   : > { %1517 = vmatprep.subr.bf16.mxu0 %v1516_v8  ;;  %v766_v8 = vld [vmem:[#allocation7 + $0x248] sm:$0xff]  ;;  %v764_v14 = vld [vmem:[#allocation7 + $0x238] sm:$0xff]  ;;  %v769_v18 = vld [vmem:[#allocation7 + $0x260] sm:$0xff] }
  0x9a   : > { %1643 = vmatpush1.bf16.msra.mxu1 %v1642_v22  ;;  %v1540_v16 = vpack.c.bf16 %v770_v9, %v766_v8  ;;  %v778_v20 = vld [vmem:[#allocation7 + $0x2a8] sm:$0xff]  ;;  %v1664_v21 = vpack.c.bf16 %v764_v14, %v760_v13  ;;  %v759_v22 = vld [vmem:[#allocation7 + $0x210] sm:$0xff]  ;;  %v768_v24 = vld [vmem:[#allocation7 + $0x258] sm:$0xff]  ;;  %v1542_v25 = vpack.c.bf16 %v769_v18, %v765_v17 }
  0x9b   : > { %1645 = vmatprep.subr.bf16.mxu1 %v1644_v0  ;;  %v763_v23 = vld [vmem:[#allocation7 + $0x230] sm:$0xff]  ;;  %v772_v0 = vld [vmem:[#allocation7 + $0x278] sm:$0xff]  ;;  %v773_v27 = vld [vmem:[#allocation7 + $0x280] sm:$0xff] }
  0x9c   : > { %1519 = vmatpush1.bf16.msra.mxu0 %v1518_v19  ;;  %v1662_v19 = vpack.c.bf16 %v755_v12, %v751_v11  ;;  %v777_v28 = vld [vmem:[#allocation7 + $0x2a0] sm:$0xff]  ;;  %v786_v31 = vld [vmem:[#allocation7 + $0x2e8] sm:$0xff]  ;;  %v1668_v32 = vpack.c.bf16 %v772_v0, %v768_v24  ;;  %v771_v34 = vld [vmem:[#allocation7 + $0x270] sm:$0xff] }
  0x9d   : > { %1521 = vmatprep.subr.bf16.mxu0 %v1520_v55  ;;  %v774_v55 = vld [vmem:[#allocation7 + $0x288] sm:$0xff]  ;;  %v776_v5 = vld [vmem:[#allocation7 + $0x298] sm:$0xff]  ;;  %v1546_v36 = vpack.c.bf16 %v777_v28, %v773_v27  ;;  %v781_v38 = vld [vmem:[#allocation7 + $0x2c0] sm:$0xff] }
  0x9e   : > { %1647 = vmatpush1.bf16.msra.mxu1 %v1646_v33  ;;  %v1544_v26 = vpack.c.bf16 %v778_v20, %v774_v55  ;;  %v767_v33 = vld [vmem:[#allocation7 + $0x250] sm:$0xff]  ;;  %v785_v39 = vld [vmem:[#allocation7 + $0x2e0] sm:$0xff]  ;;  %v794_v42 = vld [vmem:[#allocation7 + $0x328] sm:$0xff] }
  0x9f   : > { %1649 = vmatprep.subr.bf16.mxu1 %v1648_v35  ;;  %v780_v35 = vld [vmem:[#allocation7 + $0x2b8] sm:$0xff]  ;;  %v779_v45 = vld [vmem:[#allocation7 + $0x2b0] sm:$0xff]  ;;  %v1550_v48 = vpack.c.bf16 %v785_v39, %v781_v38  ;;  %v789_v50 = vld [vmem:[#allocation7 + $0x300] sm:$0xff] }
  0xa0   : > { %1523 = vmatpush1.bf16.msra.mxu0 %v1522_v29  ;;  %v1666_v29 = vpack.c.bf16 %v763_v23, %v759_v22  ;;  %v1672_v43 = vpack.c.bf16 %v780_v35, %v776_v5  ;;  %v784_v46 = vld [vmem:[#allocation7 + $0x2d8] sm:$0xff]  ;;  %v793_v51 = vld [vmem:[#allocation7 + $0x320] sm:$0xff]  ;;  %v802_v54 = vld [vmem:[#allocation7 + $0x368] sm:$0xff] }
  0xa1   : > { %1525 = vmatprep.subr.bf16.mxu0 %v1524_v30  ;;  %v782_v30 = vld [vmem:[#allocation7 + $0x2c8] sm:$0xff]  ;;  %v787_v58 = vld [vmem:[#allocation7 + $0x2f0] sm:$0xff]  ;;  %v792_v59 = vld [vmem:[#allocation7 + $0x318] sm:$0xff]  ;;  %v1554_v61 = vpack.c.bf16 %v793_v51, %v789_v50 }
  0xa2   : > { %1651 = vmatpush1.bf16.msra.mxu1 %v1650_v44  ;;  %v1548_v37 = vpack.c.bf16 %v786_v31, %v782_v30  ;;  %v775_v44 = vld [vmem:[#allocation7 + $0x290] sm:$0xff]  ;;  %v797_v63 = vld [vmem:[#allocation7 + $0x340] sm:$0xff]  ;;  %v810_v4 = vld [vmem:[#allocation7 + $0x3a8] sm:$0xff] }
  0xa3   : > { %1653 = vmatprep.subr.bf16.mxu1 %v1652_v47  ;;  %v788_v47 = vld [vmem:[#allocation7 + $0x2f8] sm:$0xff]  ;;  %v801_v1 = vld [vmem:[#allocation7 + $0x360] sm:$0xff]  ;;  %v795_v8 = vld [vmem:[#allocation7 + $0x330] sm:$0xff] }
  0xa4   : > { %1527 = vmatpush1.bf16.msra.mxu0 %v1526_v40  ;;  %v1670_v40 = vpack.c.bf16 %v771_v34, %v767_v33  ;;  %v1676_v56 = vpack.c.bf16 %v788_v47, %v784_v46  ;;  %v800_v9 = vld [vmem:[#allocation7 + $0x358] sm:$0xff]  ;;  %v1558_v11 = vpack.c.bf16 %v801_v1, %v797_v63  ;;  %v805_v13 = vld [vmem:[#allocation7 + $0x380] sm:$0xff]  ;;  %v799_v17 = vld [vmem:[#allocation7 + $0x350] sm:$0xff] }
  0xa5   : > { %1529 = vmatprep.subr.bf16.mxu0 %v1528_v41  ;;  %v790_v41 = vld [vmem:[#allocation7 + $0x308] sm:$0xff]  ;;  %v809_v14 = vld [vmem:[#allocation7 + $0x3a0] sm:$0xff]  ;;  %v803_v18 = vld [vmem:[#allocation7 + $0x370] sm:$0xff] }
  0xa6   : > { %1655 = vmatpush1.bf16.msra.mxu1 %v1654_v57  ;;  %v1552_v49 = vpack.c.bf16 %v794_v42, %v790_v41  ;;  %v783_v57 = vld [vmem:[#allocation7 + $0x2d0] sm:$0xff]  ;;  %v812_v55 = vld [vmem:[#allocation7 + $0x3b8] sm:$0xff]  ;;  %v1562_v20 = vpack.c.bf16 %v809_v14, %v805_v13  ;;  %v813_v30 = vld [vmem:[#allocation7 + $0x3c0] sm:$0xff]  ;;  %v657_v42 = vlaneseq }
  0xa7   : > { %1657 = vmatprep.subr.bf16.mxu1 %v1656_v60  ;;  %v796_v60 = vld [vmem:[#allocation7 + $0x338] sm:$0xff]  ;;  %v807_v23 = vld [vmem:[#allocation7 + $0x390] sm:$0xff]  ;;  %v817_v31 = vld [vmem:[#allocation7 + $0x3e0] sm:$0xff] }
  0xa8   : > { %1531 = vmatpush1.bf16.msra.mxu0 %v1530_v52  ;;  %v1674_v52 = vpack.c.bf16 %v779_v45, %v775_v44  ;;  %v1680_v6 = vpack.c.bf16 %v796_v60, %v792_v59  ;;  %v811_v24 = vld [vmem:[#allocation7 + $0x3b0] sm:$0xff]  ;;  %v816_v27 = vld [vmem:[#allocation7 + $0x3d8] sm:$0xff]  ;;  %v1566_v33 = vpack.c.bf16 %v817_v31, %v813_v30  ;;  %v655_v45 = vld [vmem:[%s2364_s3] sm:$0xf] }
  0xa9   : > { %1533 = vmatprep.subr.bf16.mxu0 %v1532_v53  ;;  %v798_v53 = vld [vmem:[#allocation7 + $0x348] sm:$0xff]  ;;  %v1690_v0 = vpack.c.bf16 %v811_v24, %v807_v23  ;;  %v815_v34 = vld [vmem:[#allocation7 + $0x3d0] sm:$0xff]  ;;  %v824_v38 = vld [vmem:[#allocation7 + $0x418] sm:$0xff] }
  0xaa   : > { %1659 = vmatpush1.bf16.msra.mxu1 %v1658_v7  ;;  %v1556_v62 = vpack.c.bf16 %v802_v54, %v798_v53  ;;  %v791_v7 = vld [vmem:[#allocation7 + $0x310] sm:$0xff]  ;;  %v821_v51 = vld [vmem:[#allocation7 + $0x400] sm:$0xff]  ;;  %v830_v59 = vld [vmem:[#allocation7 + $0x448] sm:$0xff] }
  0xab   : > { %1661 = vmatprep.subr.bf16.mxu1 %v1660_v10  ;;  %v804_v10 = vld [vmem:[#allocation7 + $0x378] sm:$0xff]  ;;  %v819_v5 = vld [vmem:[#allocation7 + $0x3f0] sm:$0xff] }
  0xac   : > { %1535 = vmatpush1.bf16.msra.mxu0 %v1534_v2  ;;  %v1678_v2 = vpack.c.bf16 %v787_v58, %v783_v57  ;;  %v1694_v35 = vpack.c.bf16 %v819_v5, %v815_v34  ;;  %v823_v57 = vld [vmem:[#allocation7 + $0x410] sm:$0xff]  ;;  %v836_v63 = vld [vmem:[#allocation7 + $0x478] sm:$0xff]  ;;  %v846_v34 = vld [vmem:[#allocation7 + $0x4c8] sm:$0xff] }
  0xad   : > { %1537 = vmatprep.subr.bf16.mxu0 %v1536_v3  ;;  %v806_v3 = vld [vmem:[#allocation7 + $0x388] sm:$0xff]  ;;  %v827_v58 = vld [vmem:[#allocation7 + $0x430] sm:$0xff] }
  0xae   : > { %1663 = vmatpush1.bf16.msra.mxu1 %v1662_v19  ;;  %v1560_v12 = vpack.c.bf16 %v810_v4, %v806_v3  ;;  %v808_v19 = vld [vmem:[#allocation7 + $0x398] sm:$0xff]  ;;  %v1698_v4 = vpack.c.bf16 %v827_v58, %v823_v57  ;;  %v831_v13 = vld [vmem:[#allocation7 + $0x450] sm:$0xff]  ;;  %v850_v5 = vld [vmem:[#allocation7 + $0x4e8] sm:$0xff] }
  0xaf   : > { %1665 = vmatprep.subr.bf16.mxu1 %v1664_v21  ;;  %v1686_v21 = vpack.c.bf16 %v803_v18, %v799_v17  ;;  %v1688_v22 = vpack.c.bf16 %v812_v55, %v808_v19  ;;  %v835_v14 = vld [vmem:[#allocation7 + $0x470] sm:$0xff]  ;;  %v842_v18 = vld [vmem:[#allocation7 + $0x4a8] sm:$0xff]  ;;  %v840_v19 = vld [vmem:[#allocation7 + $0x498] sm:$0xff] }
  0xb0   : > { %1539 = vmatpush1.bf16.msra.mxu0 %v1538_v15  ;;  %v1682_v15 = vpack.c.bf16 %v795_v8, %v791_v7  ;;  %v833_v7 = vld [vmem:[#allocation7 + $0x460] sm:$0xff]  ;;  %v844_v55 = vld [vmem:[#allocation7 + $0x4b8] sm:$0xff] }
  0xb1   : > { %1541 = vmatprep.subr.bf16.mxu0 %v1540_v16  ;;  %v1684_v16 = vpack.c.bf16 %v804_v10, %v800_v9  ;;  %v1704_v31 = vpack.c.bf16 %v844_v55, %v840_v19  ;;  %v856_v57 = vld [vmem:[#allocation7 + $0x518] sm:$0xff]  ;;  %v874_v19 = vld [vmem:[#allocation7 + $0x5a8] sm:$0xff] }
  0xb2   : > { %1667 = vmatpush1.bf16.msra.mxu1 %v1666_v29  ;;  %v820_v29 = vld [vmem:[#allocation7 + $0x3f8] sm:$0xff] }
  0xb3   : > { %1669 = vmatprep.subr.bf16.mxu1 %v1668_v32  ;;  %v1692_v32 = vpack.c.bf16 %v820_v29, %v816_v27  ;;  %v841_v27 = vld [vmem:[#allocation7 + $0x4a0] sm:$0xff]  ;;  %v860_v58 = vld [vmem:[#allocation7 + $0x538] sm:$0xff] }
  0xb4   : > { %1543 = vmatpush1.bf16.msra.mxu0 %v1542_v25  ;;  %v814_v25 = vld [vmem:[#allocation7 + $0x3c8] sm:$0xff]  ;;  %v872_v55 = vld [vmem:[#allocation7 + $0x598] sm:$0xff] }
  0xb5   : > { %1545 = vmatprep.subr.bf16.mxu0 %v1544_v26  ;;  %v818_v26 = vld [vmem:[#allocation7 + $0x3e8] sm:$0xff] }
  0xb6   : > { %1671 = vmatpush1.bf16.msra.mxu1 %v1670_v40  ;;  %v1564_v28 = vpack.c.bf16 %v818_v26, %v814_v25  ;;  %v828_v40 = vld [vmem:[#allocation7 + $0x438] sm:$0xff]  ;;  %v1702_v25 = vpack.c.bf16 %v835_v14, %v831_v13  ;;  %v837_v26 = vld [vmem:[#allocation7 + $0x480] sm:$0xff] }
  0xb7   : > { %1673 = vmatprep.subr.bf16.mxu1 %v1672_v43  ;;  %v1696_v41 = vpack.c.bf16 %v828_v40, %v824_v38  ;;  %v2269_v43 = vshrl.u32 %v657_v42, 7  ;;  %v865_v13 = vld [vmem:[#allocation7 + $0x560] sm:$0xff] }
  0xb8   : > { %1547 = vmatpush1.bf16.msra.mxu0 %v1546_v36  ;;  %v822_v36 = vld [vmem:[#allocation7 + $0x408] sm:$0xff] }
  0xb9   : > { %1549 = vmatprep.subr.bf16.mxu0 %v1548_v37  ;;  %v826_v37 = vld [vmem:[#allocation7 + $0x428] sm:$0xff]  ;;  %v659_v44 = vsub.s32 0, %v2269_v43  ;;  %v663_v46 = vsub.s32 1, %v2269_v43  ;;  %v671_v53 = vsub.s32 3, %v2269_v43 }
  0xba   : > { %1675 = vmatpush1.bf16.msra.mxu1 %v1674_v52  ;;  %v1568_v39 = vpack.c.bf16 %v826_v37, %v822_v36  ;;  %v825_v52 = vld [vmem:[#allocation7 + $0x420] sm:$0xff]  ;;  %v852_v36 = vld [vmem:[#allocation7 + $0x4f8] sm:$0xff] }
  0xbb   : > { %1677 = vmatprep.subr.bf16.mxu1 %v1676_v56  ;;  %v660_v47 = vrot.slane %v655_v45, %v659_v44  ;;  %v1570_v3 = vpack.c.bf16 %v825_v52, %v821_v51  ;;  %v2286_v9 = vrot.slane %v655_v45, %v671_v53  ;;  %v847_v51 = vld [vmem:[#allocation7 + $0x4d0] sm:$0xff] }
  0xbc   : > { %1551 = vmatpush1.bf16.msra.mxu0 %v1550_v48  ;;  %v664_v48 = vrot.slane %v655_v45, %v663_v46  ;;  %v851_v52 = vld [vmem:[#allocation7 + $0x4f0] sm:$0xff] }
  0xbd   : > { %1553 = vmatprep.subr.bf16.mxu0 %v1552_v49  ;;  %v667_v49 = vsub.s32 2, %v2269_v43 }
  0xbe   : > { %1679 = vmatpush1.bf16.msra.mxu1 %v1678_v2 }
  0xbf   : > { %1681 = vmatprep.subr.bf16.mxu1 %v1680_v6  ;;  %v668_v1 = vrot.slane %v655_v45, %v667_v49  ;;  %v829_v6 = vld [vmem:[#allocation7 + $0x440] sm:$0xff] }
  0xc0   : > { %1555 = vmatpush1.bf16.msra.mxu0 %v1554_v61  ;;  %v834_v61 = vld [vmem:[#allocation7 + $0x468] sm:$0xff]  ;;  %v845_v45 = vld [vmem:[#allocation7 + $0x4c0] sm:$0xff] }
  0xc1   : > { %1557 = vmatprep.subr.bf16.mxu0 %v1556_v62  ;;  %v832_v62 = vld [vmem:[#allocation7 + $0x458] sm:$0xff] }
  0xc2   : > { %1683 = vmatpush1.bf16.msra.mxu1 %v1682_v15  ;;  %v838_v15 = vld [vmem:[#allocation7 + $0x488] sm:$0xff] }
  0xc3   : > { %1685 = vmatprep.subr.bf16.mxu1 %v1684_v16  ;;  %v1576_v30 = vpack.c.bf16 %v842_v18, %v838_v15  ;;  %v870_v18 = vld [vmem:[#allocation7 + $0x588] sm:$0xff] }
  0xc4   : > { %1559 = vmatpush1.bf16.msra.mxu0 %v1558_v11  ;;  %v1572_v11 = vpack.c.bf16 %v834_v61, %v830_v59  ;;  %v853_v61 = vld [vmem:[#allocation7 + $0x500] sm:$0xff] }
  0xc5   : > { %1561 = vmatprep.subr.bf16.mxu0 %v1560_v12  ;;  %v1700_v12 = vpack.c.bf16 %v836_v63, %v832_v62  ;;  %v857_v62 = vld [vmem:[#allocation7 + $0x520] sm:$0xff] }
  0xc6   : > { %1687 = vmatpush1.bf16.msra.mxu1 %v1686_v21 }
  0xc7   : > { %1689 = vmatprep.subr.bf16.mxu1 %v1688_v22 }
  0xc8   : > { %1563 = vmatpush1.bf16.msra.mxu0 %v1562_v20 }
  0xc9   : > { %1565 = vmatprep.subr.bf16.mxu0 %v1564_v28 }
  0xca   : > { %1691 = vmatpush1.bf16.msra.mxu1 %v1690_v0  ;;  %v1574_v0 = vpack.c.bf16 %v833_v7, %v829_v6  ;;  %v866_v6 = vld [vmem:[#allocation7 + $0x568] sm:$0xff]  ;;  %v864_v7 = vld [vmem:[#allocation7 + $0x558] sm:$0xff] }
  0xcb   : > { %1693 = vmatprep.subr.bf16.mxu1 %v1692_v32  ;;  %v839_v32 = vld [vmem:[#allocation7 + $0x490] sm:$0xff] }
  0xcc   : > { %1567 = vmatpush1.bf16.msra.mxu0 %v1566_v33  ;;  %v843_v33 = vld [vmem:[#allocation7 + $0x4b0] sm:$0xff] }
  0xcd   : > { %1569 = vmatprep.subr.bf16.mxu0 %v1568_v39  ;;  %v1706_v42 = vpack.c.bf16 %v843_v33, %v839_v32  ;;  %v884_v32 = vld [vmem:[#allocation7 + $0x5f8] sm:$0xff] }
  0xce   : > { %1695 = vmatpush1.bf16.msra.mxu1 %v1694_v35  ;;  %v848_v35 = vld [vmem:[#allocation7 + $0x4d8] sm:$0xff] }
  0xcf   : > { %1697 = vmatprep.subr.bf16.mxu1 %v1696_v41  ;;  %v1578_v41 = vpack.c.bf16 %v841_v27, %v837_v26  ;;  %v871_v27 = vld [vmem:[#allocation7 + $0x590] sm:$0xff] }
 0x152   : > { %v413_v50 = vpop.f32.mrb[0].mxu0 }
 0x153   : > { %v677_v54 = vadd.f32 %v660_v47, %v413_v50  ;;  %v415_v56 = vpop.f32.mrb[1].mxu0  ;;  %v1708_v50 = vpack.c.bf16 %v852_v36, %v848_v35  ;;  %v881_v35 = vld [vmem:[#allocation7 + $0x5e0] sm:$0xff] }
 0x154   : > { %v678_v60 = vadd.f32 %v664_v48, %v415_v56  ;;  %v490_v21 = vpop.f32.mrb[0].mxu1  ;;  %v858_v56 = vld [vmem:[#allocation7 + $0x528] sm:$0xff] }
 0x155   : > { %v685_v10 = vmax.f32 %v677_v54, 0.0  ;;  %v2288_v23 = vadd.f32 %v668_v1, %v490_v21  ;;  %v492_v24 = vpop.f32.mrb[1].mxu1  ;;  %v854_v54 = vld [vmem:[#allocation7 + $0x508] sm:$0xff] }
 0x156   : > { %v686_v2 = vmax.f32 %v678_v60, 0.0  ;;  %v419_v8 = vpop.f32.mrb[2].mxu0  ;;  %v680_v29 = vadd.f32 %v2286_v9, %v492_v24  ;;  %v1710_v60 = vpack.c.bf16 %v851_v52, %v847_v51  ;;  %v1584_v63 = vpack.c.bf16 %v858_v56, %v854_v54  ;;  %v869_v24 = vld [vmem:[#allocation7 + $0x580] sm:$0xff] }
 0x157   : > { %v681_v16 = vadd.f32 %v660_v47, %v419_v8  ;;  %v421_v17 = vpop.f32.mrb[3].mxu0  ;;  %v849_v47 = vld [vmem:[#allocation7 + $0x4e0] sm:$0xff]  ;;  %v868_v8 = vld [vmem:[#allocation7 + $0x578] sm:$0xff] }
 0x158   : > { %1013 = vmatprep.mubr.f32.mxu0 %v686_v2  ;;  %1167 = vmatprep.mubr.f32.mxu1 %v686_v2  ;;  %v682_v20 = vadd.f32 %v664_v48, %v421_v17  ;;  %v688_v37 = vmax.f32 %v680_v29, 0.0  ;;  %v496_v38 = vpop.f32.mrb[2].mxu1  ;;  %v1580_v48 = vpack.c.bf16 %v850_v5, %v846_v34  ;;  %v1582_v59 = vpack.c.bf16 %v849_v47, %v845_v45  ;;  %v855_v2 = vld [vmem:[#allocation7 + $0x510] sm:$0xff]  ;;  %v878_v29 = vld [vmem:[#allocation7 + $0x5c8] sm:$0xff]  ;;  %v877_v5 = vld [vmem:[#allocation7 + $0x5c0] sm:$0xff] }
 0x159   : > { %1014 = vmatmul.mubr.f32.vlgmr.msra.gmra.mrb[4].mxu0 %v685_v10  ;;  %1168 = vmatmul.mubr.f32.vlgmr.msra.gmra.mrb[4].mxu1 %v685_v10  ;;  %v689_v22 = vmax.f32 %v681_v16, 0.0  ;;  %v2291_v39 = vadd.f32 %v668_v1, %v496_v38  ;;  %v2293_v40 = vpop.f32.mrb[3].mxu1  ;;  %v1712_v1 = vpack.c.bf16 %v860_v58, %v856_v57  ;;  %v1586_v10 = vpack.c.bf16 %v857_v62, %v853_v61  ;;  %v863_v16 = vld [vmem:[#allocation7 + $0x550] sm:$0xff]  ;;  %v890_v45 = vld [vmem:[#allocation7 + $0x628] sm:$0xff]  ;;  %v888_v47 = vld [vmem:[#allocation7 + $0x618] sm:$0xff] }
 0x15a   : > { %1571 = vmatpush1.bf16.msra.mxu0 %v1570_v3  ;;  %1699 = vmatpush1.bf16.msra.mxu1 %v1698_v4  ;;  %v690_v28 = vmax.f32 %v682_v20, 0.0  ;;  %v859_v3 = vld [vmem:[#allocation7 + $0x530] sm:$0xff]  ;;  %v862_v4 = vld [vmem:[#allocation7 + $0x548] sm:$0xff]  ;;  %v1716_v15 = vpack.c.bf16 %v868_v8, %v864_v7  ;;  %v876_v20 = vld [vmem:[#allocation7 + $0x5b8] sm:$0xff] }
 0x15b   : > { %1573 = vmatprep.subr.bf16.mxu0 %v1572_v11  ;;  %1701 = vmatprep.subr.bf16.mxu1 %v1700_v12  ;;  %v1714_v11 = vpack.c.bf16 %v859_v3, %v855_v2  ;;  %v861_v12 = vld [vmem:[#allocation7 + $0x540] sm:$0xff]  ;;  %v1588_v14 = vpack.c.bf16 %v866_v6, %v862_v4  ;;  %v867_v17 = vld [vmem:[#allocation7 + $0x570] sm:$0xff]  ;;  %v1720_v26 = vpack.c.bf16 %v876_v20, %v872_v55  ;;  %v898_v61 = vld [vmem:[#allocation7 + $0x668] sm:$0xff] }
 0x15c   : > { %1019 = vmatprep.mubr.f32.mxu0 %v690_v28  ;;  %1173 = vmatprep.mubr.f32.mxu1 %v690_v28  ;;  %v1590_v21 = vpack.c.bf16 %v865_v13, %v861_v12  ;;  %v875_v28 = vld [vmem:[#allocation7 + $0x5b0] sm:$0xff]  ;;  %v885_v52 = vld [vmem:[#allocation7 + $0x600] sm:$0xff]  ;;  %v896_v62 = vld [vmem:[#allocation7 + $0x658] sm:$0xff] }
 0x15d   : > { %1020 = vmatmul.mubr.f32.gmra.mrb[6].mxu0 %v689_v22  ;;  %1174 = vmatmul.mubr.f32.gmra.mrb[6].mxu1 %v689_v22  ;;  %v1718_v22 = vpack.c.bf16 %v867_v17, %v863_v16  ;;  %v1722_v34 = vpack.c.bf16 %v875_v28, %v871_v27  ;;  %v879_v38 = vld [vmem:[#allocation7 + $0x5d0] sm:$0xff]  ;;  %v889_v54 = vld [vmem:[#allocation7 + $0x620] sm:$0xff]  ;;  %v906_v12 = vld [vmem:[#allocation7 + $0x6a8] sm:$0xff] }
 0x15e   : > { %1575 = vmatpush1.bf16.msra.mxu0 %v1574_v0  ;;  %1703 = vmatpush1.bf16.msra.mxu1 %v1702_v25  ;;  %v873_v0 = vld [vmem:[#allocation7 + $0x5a0] sm:$0xff]  ;;  %v1592_v25 = vpack.c.bf16 %v874_v19, %v870_v18  ;;  %v887_v58 = vld [vmem:[#allocation7 + $0x610] sm:$0xff]  ;;  %v904_v13 = vld [vmem:[#allocation7 + $0x698] sm:$0xff] }
 0x15f   : > { %1577 = vmatprep.subr.bf16.mxu0 %v1576_v30  ;;  %1705 = vmatprep.subr.bf16.mxu1 %v1704_v31  ;;  %v882_v30 = vld [vmem:[#allocation7 + $0x5e8] sm:$0xff]  ;;  %v880_v31 = vld [vmem:[#allocation7 + $0x5d8] sm:$0xff]  ;;  %v1594_v33 = vpack.c.bf16 %v873_v0, %v869_v24  ;;  %v893_v3 = vld [vmem:[#allocation7 + $0x640] sm:$0xff] }
 0x160   : > { %1090 = vmatprep.mubr.f32.mxu0 %v688_v37  ;;  %1244 = vmatprep.mubr.f32.mxu1 %v688_v37  ;;  %v1596_v36 = vpack.c.bf16 %v882_v30, %v878_v29  ;;  %v1724_v37 = vpack.c.bf16 %v884_v32, %v880_v31  ;;  %v897_v4 = vld [vmem:[#allocation7 + $0x660] sm:$0xff]  ;;  %v895_v8 = vld [vmem:[#allocation7 + $0x650] sm:$0xff]  ;;  %v914_v24 = vld [vmem:[#allocation7 + $0x6e8] sm:$0xff] }
 0x161   : > { %v901_v17 = vld [vmem:[#allocation7 + $0x680] sm:$0xff]  ;;  %v903_v20 = vld [vmem:[#allocation7 + $0x690] sm:$0xff]  ;;  %v912_v0 = vld [vmem:[#allocation7 + $0x6d8] sm:$0xff] }
 0x162   : > { %1579 = vmatpush1.bf16.msra.mxu0 %v1578_v41  ;;  %1707 = vmatpush1.bf16.msra.mxu1 %v1706_v42  ;;  %v883_v41 = vld [vmem:[#allocation7 + $0x5f0] sm:$0xff]  ;;  %v886_v42 = vld [vmem:[#allocation7 + $0x608] sm:$0xff]  ;;  %v905_v18 = vld [vmem:[#allocation7 + $0x6a0] sm:$0xff] }
 0x163   : > { %1581 = vmatprep.subr.bf16.mxu0 %v1580_v48  ;;  %1709 = vmatprep.subr.bf16.mxu1 %v1708_v50  ;;  %v892_v48 = vld [vmem:[#allocation7 + $0x638] sm:$0xff]  ;;  %v1598_v50 = vpack.c.bf16 %v881_v35, %v877_v5  ;;  %v1726_v51 = vpack.c.bf16 %v883_v41, %v879_v38  ;;  %v1600_v56 = vpack.c.bf16 %v890_v45, %v886_v42  ;;  %v909_v28 = vld [vmem:[#allocation7 + $0x6c0] sm:$0xff]  ;;  %v911_v32 = vld [vmem:[#allocation7 + $0x6d0] sm:$0xff] }
 0x164   : > { %v1728_v57 = vpack.c.bf16 %v892_v48, %v888_v47  ;;  %v913_v29 = vld [vmem:[#allocation7 + $0x6e0] sm:$0xff]  ;;  %v922_v5 = vld [vmem:[#allocation7 + $0x728] sm:$0xff]  ;;  %v920_v35 = vld [vmem:[#allocation7 + $0x718] sm:$0xff] }
 0x165   : > { %v917_v41 = vld [vmem:[#allocation7 + $0x700] sm:$0xff]  ;;  %v919_v48 = vld [vmem:[#allocation7 + $0x710] sm:$0xff] }
 0x166   : > { %1583 = vmatpush1.bf16.msra.mxu0 %v1582_v59  ;;  %1711 = vmatpush1.bf16.msra.mxu1 %v1710_v60  ;;  %v891_v59 = vld [vmem:[#allocation7 + $0x630] sm:$0xff]  ;;  %v894_v60 = vld [vmem:[#allocation7 + $0x648] sm:$0xff]  ;;  %v921_v42 = vld [vmem:[#allocation7 + $0x720] sm:$0xff] }
 0x167   : > { %1585 = vmatprep.subr.bf16.mxu0 %v1584_v63  ;;  %1713 = vmatprep.subr.bf16.mxu1 %v1712_v1  ;;  %v900_v63 = vld [vmem:[#allocation7 + $0x678] sm:$0xff]  ;;  %v1602_v1 = vpack.c.bf16 %v889_v54, %v885_v52  ;;  %v1730_v2 = vpack.c.bf16 %v891_v59, %v887_v58  ;;  %v1604_v6 = vpack.c.bf16 %v898_v61, %v894_v60  ;;  %v930_v52 = vld [vmem:[#allocation7 + $0x768] sm:$0xff]  ;;  %v925_v59 = vld [vmem:[#allocation7 + $0x740] sm:$0xff] }
 0x168   : > { %v1732_v7 = vpack.c.bf16 %v900_v63, %v896_v62  ;;  %v928_v54 = vld [vmem:[#allocation7 + $0x758] sm:$0xff]  ;;  %v929_v60 = vld [vmem:[#allocation7 + $0x760] sm:$0xff]  ;;  %v927_v63 = vld [vmem:[#allocation7 + $0x750] sm:$0xff] }
 0x16a   : > { %1587 = vmatpush1.bf16.msra.mxu0 %v1586_v10  ;;  %1715 = vmatpush1.bf16.msra.mxu1 %v1714_v11  ;;  %v899_v10 = vld [vmem:[#allocation7 + $0x670] sm:$0xff]  ;;  %v902_v11 = vld [vmem:[#allocation7 + $0x688] sm:$0xff] }
 0x16b   : > { %1589 = vmatprep.subr.bf16.mxu0 %v1588_v14  ;;  %1717 = vmatprep.subr.bf16.mxu1 %v1716_v15  ;;  %v908_v14 = vld [vmem:[#allocation7 + $0x6b8] sm:$0xff]  ;;  %v1606_v15 = vpack.c.bf16 %v897_v4, %v893_v3  ;;  %v1734_v16 = vpack.c.bf16 %v899_v10, %v895_v8  ;;  %v1608_v19 = vpack.c.bf16 %v906_v12, %v902_v11  ;;  %v938_v3 = vld [vmem:[#allocation7 + $0x7a8] sm:$0xff]  ;;  %v933_v10 = vld [vmem:[#allocation7 + $0x780] sm:$0xff] }
 0x16c   : > { %v1736_v55 = vpack.c.bf16 %v908_v14, %v904_v13  ;;  %v936_v4 = vld [vmem:[#allocation7 + $0x798] sm:$0xff]  ;;  %v937_v11 = vld [vmem:[#allocation7 + $0x7a0] sm:$0xff]  ;;  %v935_v14 = vld [vmem:[#allocation7 + $0x790] sm:$0xff] }
 0x16e   : > { %1591 = vmatpush1.bf16.msra.mxu0 %v1590_v21  ;;  %1719 = vmatpush1.bf16.msra.mxu1 %v1718_v22  ;;  %v907_v21 = vld [vmem:[#allocation7 + $0x6b0] sm:$0xff]  ;;  %v910_v22 = vld [vmem:[#allocation7 + $0x6c8] sm:$0xff] }
 0x16f   : > { %1593 = vmatprep.subr.bf16.mxu0 %v1592_v25  ;;  %1721 = vmatprep.subr.bf16.mxu1 %v1720_v26  ;;  %v916_v25 = vld [vmem:[#allocation7 + $0x6f8] sm:$0xff]  ;;  %v1610_v26 = vpack.c.bf16 %v905_v18, %v901_v17  ;;  %v1738_v27 = vpack.c.bf16 %v907_v21, %v903_v20  ;;  %v1612_v30 = vpack.c.bf16 %v914_v24, %v910_v22  ;;  %v946_v17 = vld [vmem:[#allocation7 + $0x7e8] sm:$0xff]  ;;  %v941_v21 = vld [vmem:[#allocation7 + $0x7c0] sm:$0xff] }
 0x170   : > { %v1740_v31 = vpack.c.bf16 %v916_v25, %v912_v0  ;;  %v944_v18 = vld [vmem:[#allocation7 + $0x7d8] sm:$0xff]  ;;  %v945_v0 = vld [vmem:[#allocation7 + $0x7e0] sm:$0xff]  ;;  %v943_v25 = vld [vmem:[#allocation7 + $0x7d0] sm:$0xff] }
 0x172   : > { %1595 = vmatpush1.bf16.msra.mxu0 %v1594_v33  ;;  %1723 = vmatpush1.bf16.msra.mxu1 %v1722_v34  ;;  %v915_v33 = vld [vmem:[#allocation7 + $0x6f0] sm:$0xff]  ;;  %v918_v34 = vld [vmem:[#allocation7 + $0x708] sm:$0xff] }
 0x173   : > { %1597 = vmatprep.subr.bf16.mxu0 %v1596_v36  ;;  %1725 = vmatprep.subr.bf16.mxu1 %v1724_v37  ;;  %v924_v36 = vld [vmem:[#allocation7 + $0x738] sm:$0xff]  ;;  %v1614_v37 = vpack.c.bf16 %v913_v29, %v909_v28  ;;  %v1742_v38 = vpack.c.bf16 %v915_v33, %v911_v32  ;;  %v1616_v45 = vpack.c.bf16 %v922_v5, %v918_v34  ;;  %v691_v32 = vmax.f32 %v2291_v39, 0.0 }
 0x174   : > { %v1744_v47 = vpack.c.bf16 %v924_v36, %v920_v35  ;;  %v1630_v28 = vpack.c.bf16 %v945_v0, %v941_v21 }
 0x176   : > { %1599 = vmatpush1.bf16.msra.mxu0 %v1598_v50  ;;  %1727 = vmatpush1.bf16.msra.mxu1 %v1726_v51  ;;  %v923_v50 = vld [vmem:[#allocation7 + $0x730] sm:$0xff]  ;;  %v926_v51 = vld [vmem:[#allocation7 + $0x748] sm:$0xff] }
 0x177   : > { %1601 = vmatprep.subr.bf16.mxu0 %v1600_v56  ;;  %1729 = vmatprep.subr.bf16.mxu1 %v1728_v57  ;;  %v932_v56 = vld [vmem:[#allocation7 + $0x778] sm:$0xff]  ;;  %v1618_v57 = vpack.c.bf16 %v921_v42, %v917_v41  ;;  %v1746_v58 = vpack.c.bf16 %v923_v50, %v919_v48  ;;  %v1620_v61 = vpack.c.bf16 %v930_v52, %v926_v51 }
 0x178   : > { %v1748_v62 = vpack.c.bf16 %v932_v56, %v928_v54 }
 0x17a   : > { %1603 = vmatpush1.bf16.msra.mxu0 %v1602_v1  ;;  %1731 = vmatpush1.bf16.msra.mxu1 %v1730_v2  ;;  %v931_v1 = vld [vmem:[#allocation7 + $0x770] sm:$0xff]  ;;  %v934_v2 = vld [vmem:[#allocation7 + $0x788] sm:$0xff] }
 0x17b   : > { %1605 = vmatprep.subr.bf16.mxu0 %v1604_v6  ;;  %1733 = vmatprep.subr.bf16.mxu1 %v1732_v7  ;;  %v940_v6 = vld [vmem:[#allocation7 + $0x7b8] sm:$0xff]  ;;  %v1622_v7 = vpack.c.bf16 %v929_v60, %v925_v59  ;;  %v1750_v8 = vpack.c.bf16 %v931_v1, %v927_v63  ;;  %v1624_v12 = vpack.c.bf16 %v938_v3, %v934_v2 }
 0x17c   : > { %v1752_v13 = vpack.c.bf16 %v940_v6, %v936_v4 }
 0x17e   : > { %1607 = vmatpush1.bf16.msra.mxu0 %v1606_v15  ;;  %1735 = vmatpush1.bf16.msra.mxu1 %v1734_v16  ;;  %v939_v15 = vld [vmem:[#allocation7 + $0x7b0] sm:$0xff]  ;;  %v942_v16 = vld [vmem:[#allocation7 + $0x7c8] sm:$0xff] }
 0x17f   : > { %1609 = vmatprep.subr.bf16.mxu0 %v1608_v19  ;;  %1737 = vmatprep.subr.bf16.mxu1 %v1736_v55  ;;  %v948_v19 = vld [vmem:[#allocation7 + $0x7f8] sm:$0xff]  ;;  %v1626_v55 = vpack.c.bf16 %v937_v11, %v933_v10  ;;  %v1754_v20 = vpack.c.bf16 %v939_v15, %v935_v14  ;;  %v1628_v22 = vpack.c.bf16 %v946_v17, %v942_v16 }
 0x180   : > { %v1756_v24 = vpack.c.bf16 %v948_v19, %v944_v18 }
 0x182   : > { %1611 = vmatpush1.bf16.msra.mxu0 %v1610_v26  ;;  %1739 = vmatpush1.bf16.msra.mxu1 %v1738_v27  ;;  %v947_v26 = vld [vmem:[#allocation7 + $0x7f0] sm:$0xff]  ;;  %v684_v27 = vadd.f32 %v2286_v9, %v2293_v40  ;;  %v1257_v9 = vld [vmem:[%s2365_s4] sm:$0xf] }
 0x183   : > { %1613 = vmatprep.subr.bf16.mxu0 %v1612_v30  ;;  %1741 = vmatprep.subr.bf16.mxu1 %v1740_v31  ;;  %v1758_v29 = vpack.c.bf16 %v947_v26, %v943_v25  ;;  %v687_v31 = vmax.f32 %v2288_v23, 0.0  ;;  %v1262_v40 = vrot.slane %v1257_v9, %v659_v44  ;;  %v1270_v33 = vrot.slane %v1257_v9, %v667_v49 }
 0x184   : > { %v692_v30 = vmax.f32 %v684_v27, 0.0  ;;  %v1266_v23 = vrot.slane %v1257_v9, %v663_v46  ;;  %v1274_v34 = vrot.slane %v1257_v9, %v671_v53 }
 0x186   : > { %1615 = vmatpush1.bf16.msra.mxu0 %v1614_v37  ;;  %1743 = vmatpush1.bf16.msra.mxu1 %v1742_v38 }
 0x187   : > { %1617 = vmatprep.subr.bf16.mxu0 %v1616_v45  ;;  %1745 = vmatprep.subr.bf16.mxu1 %v1744_v47 }
 0x18a   : > { %1619 = vmatpush1.bf16.msra.mxu0 %v1618_v57  ;;  %1747 = vmatpush1.bf16.msra.mxu1 %v1746_v58 }
 0x18b   : > { %1621 = vmatprep.subr.bf16.mxu0 %v1620_v61  ;;  %1749 = vmatprep.subr.bf16.mxu1 %v1748_v62 }
 0x18e   : > { %1623 = vmatpush1.bf16.msra.mxu0 %v1622_v7  ;;  %1751 = vmatpush1.bf16.msra.mxu1 %v1750_v8 }
 0x18f   : > { %1625 = vmatprep.subr.bf16.mxu0 %v1624_v12  ;;  %1753 = vmatprep.subr.bf16.mxu1 %v1752_v13 }
 0x192   : > { %1627 = vmatpush1.bf16.msra.mxu0 %v1626_v55  ;;  %1755 = vmatpush1.bf16.msra.mxu1 %v1754_v20 }
 0x193   : > { %1629 = vmatprep.subr.bf16.mxu0 %v1628_v22  ;;  %1757 = vmatprep.subr.bf16.mxu1 %v1756_v24 }
 0x196   : > { %1631 = vmatpush1.bf16.msra.mxu0 %v1630_v28  ;;  %1759 = vmatpush1.bf16.msra.mxu1 %v1758_v29 }
 0x199   : > { %1091 = vmatmul.mubr.f32.vlgmr.msra.gmra.mrb[4].mxu0 %v687_v31  ;;  %1245 = vmatmul.mubr.f32.vlgmr.msra.gmra.mrb[4].mxu1 %v687_v31 }
 0x19a   : > { %1096 = vmatprep.mubr.f32.mxu0 %v692_v30  ;;  %1250 = vmatprep.mubr.f32.mxu1 %v692_v30 }
 0x19d   : > { %1097 = vmatmul.mubr.f32.gmra.mrb[6].mxu0 %v691_v32  ;;  %1251 = vmatmul.mubr.f32.gmra.mrb[6].mxu1 %v691_v32 }
 0x26c   : > { %v1092_v39 = vpop.f32.mrb[4].mxu0  ;;  %v1246_v5 = vpop.f32.mrb[4].mxu1 }
 0x26d   : > { %v1279_v35 = vadd.f32 %v1262_v40, %v1092_v39  ;;  %v1281_v36 = vadd.f32 %v1270_v33, %v1246_v5  ;;  %v1094_v37 = vpop.f32.mrb[5].mxu0  ;;  %v1248_v38 = vpop.f32.mrb[5].mxu1 }
 0x26e   : > { %v1280_v41 = vadd.f32 %v1266_v23, %v1094_v37  ;;  %v1282_v42 = vadd.f32 %v1274_v34, %v1248_v38 }
 0x26f   : > { %v1287_v44 = vmax.f32 %v1279_v35, 0.0  ;;  %v1289_v49 = vmax.f32 %v1281_v36, 0.0 }
 0x270   : > { %v1288_v45 = vmax.f32 %v1280_v41, 0.0  ;;  %v1290_v47 = vmax.f32 %v1282_v42, 0.0  ;;  %v1098_v46 = vpop.f32.mrb[6].mxu0  ;;  %v1252_v48 = vpop.f32.mrb[6].mxu1 }
 0x271   : > { %1295 = vst [vmem:[%s271_s13] sm:$0xff] %v1287_v44  ;;  %1297 = vst [vmem:[%s271_s13 + $0x10] sm:$0xff] %v1289_v49  ;;  %v1283_v43 = vadd.f32 %v1262_v40, %v1098_v46  ;;  %v1285_v53 = vadd.f32 %v1270_v33, %v1252_v48  ;;  %v1100_v50 = vpop.f32.mrb[7].mxu0  ;;  %v1254_v51 = vpop.f32.mrb[7].mxu1 }
 0x272   : > { %1296 = vst [vmem:[%s271_s13 + $0x8] sm:$0xff] %v1288_v45  ;;  %1298 = vst [vmem:[%s271_s13 + $0x18] sm:$0xff] %v1290_v47  ;;  %v1284_v52 = vadd.f32 %v1266_v23, %v1100_v50  ;;  %v1286_v54 = vadd.f32 %v1274_v34, %v1254_v51 }
 0x273   : > { %v1291_v56 = vmax.f32 %v1283_v43, 0.0  ;;  %v1293_v57 = vmax.f32 %v1285_v53, 0.0 }
 0x274   : > { %v1292_v58 = vmax.f32 %v1284_v52, 0.0  ;;  %v1294_v59 = vmax.f32 %v1286_v54, 0.0 }
 0x275   : > { %1299 = vst [vmem:[%s271_s13 + $0x20] sm:$0xff] %v1291_v56  ;;  %1301 = vst [vmem:[%s271_s13 + $0x30] sm:$0xff] %v1293_v57 }
 0x276   : > { %1300 = vst [vmem:[%s271_s13 + $0x28] sm:$0xff] %v1292_v58  ;;  %1302 = vst [vmem:[%s271_s13 + $0x38] sm:$0xff] %v1294_v59 }
 0x277   : > { %1951 = shalt.err (!%p1948_p2)
}
 0x278   : > { %s1952_s24 = scalar_lea.hbm %s2317_s11, 1024  ;;  %s1956_s28 = scalar_lea.hbm %s2366_s5, 2048 }
 0x279   : > { %p1953_p13 = scmp.ne.s32.totalorder %s2317_s11, %s1952_s24  ;;  %p1957_p4 = scmp.lt.u32.totalorder %s2317_s11, %s2366_s5 }
 0x27a   : > { %p1958_p7 = scmp.lt.u32.totalorder %s1956_s28, %s1952_s24  ;;  %p1960_p11 = scmp.lt.u32.totalorder %s1952_s24, %s2317_s11 }
 0x27b   : > { %p1954_p6 = pnand %p1953_p13, %p2380_p0 }
 0x27c   : > { %p1959_p8 = por %p1958_p7, %p1957_p4 }
 0x27d   : > { %p1955_p10 = pneg %p1954_p6 }
 0x27e   : > { %p1961_p1 = por %p1960_p11, %p1959_p8 }
 0x280   : > { %p1962_p3 = pnand %p1961_p1, %p1955_p10 }
 0x282   : > { %1965 = shalt.err (!%p1962_p3)
}
 0x283   : > { %s2021_s8 = smov 512   ;;  %s2022_s9 = smov 32  }
 0x284   : > { %1786 = dma.vmem_to_hbm [thread:$0]  (%p2380_p0), %s2312_s29, 1024, %s2317_s11, %s1304_s14, %s2021_s8, %s2021_s8, %s2022_s9  }
 0x285 PF: > { %s1333_s22 = sand.u32 1, %s1996_s18   ;;  %p2381_p5 = scmp.ne.s32.totalorder %s2371_s25, 0 }
 0x286   : > { %p2382_p9 = scmp.ge.s32.totalorder %s2008_s21, 2  ;;  %s1334_s15 = scalar_lea.sflag [#allocation4], %s1333_s22 }
 0x288   : > { %p1800_p12 = pnand %p2382_p9, %p2381_p5 }
 0x28a   : > { %1991 = dma.done.wait (!%p1800_p12), %s1334_s15, 1024  }
 0x28b   : > { %1993 = vsyncadd (!%p1800_p12), %s1334_s15, 4294966272  ;;  %p19_p2 = scmp.ge.s32.totalorder %s2163_s16, 4   ;;  %s2383_s18 = smov %s2000_s19 }
 0x28c   : > { %s2384_s19 = smov %s2004_s20  ;;  %s2385_s20 = smov %s2172_s27 }
 0x28d   : > { %s2386_s21 = smov %s2163_s16  ;;  %21 = sbr.rel (!%p19_p2) target bundleno = 6 (0x6), region = 93 }
 0x294   :  { %1339 = vsyncpa [#allocation3], 1 }
 0x295   :  { %1341 = vsyncpa [#allocation3 + $0x1], 1 }
 0x296   :  { %1342 = vsyncpa [#allocation6], 1 }
 0x297   :  { %1343 = vsyncpa [#allocation4], 1 }
 0x298   :  { %1345 = vsyncpa [#allocation4 + $0x1], 1 }

</bundles_post_ra>
